<compile_context>
chip_gen: v7x
topology: tpu7x:2x2x1
jax: 0.10.0
libtpu: 0.0.40
codegen_flags: <defaults>
</compile_context>

<pallas_src>
import functools
import math

import jax
import jax.numpy as jnp
from jax.experimental import pallas as pl
from jax.experimental.pallas import tpu as pltpu

BASE_DIM = 128                 # base_dim of the PyTorch module
HID1 = 256                     # base_network hidden
CRIT_HID = 512                 # critic hidden
COMP_HID = BASE_DIM // 2       # complexity_head hidden (64)
LSTM_GATES = 3 * BASE_DIM      # 384: i, g, o only (forget gate dead, c0 == 0)

_SQRT_HALF = 1.0 / math.sqrt(2.0)


def _gelu_exact(x):
    # PyTorch nn.GELU() default = exact (erf-based) GELU.
    return 0.5 * x * (1.0 + jax.lax.erf(x * _SQRT_HALF))


def _round_up(a, m):
    return ((a + m - 1) // m) * m


# -----------------------------------------------------------------------------
# Kernel
# -----------------------------------------------------------------------------
def _metacog_kernel(
    x_ref,
    bw1_ref, bb1_ref, bw2_ref, bb2_ref,              # base_network
    cw1x_ref, cw1b_ref, cb1_ref, cw2_ref, cb2_ref,   # critic (first layer split)
    lw_ref, lb_ref,                                  # LSTM (i, g, o cols of W_ih^T)
    xw1_ref, xb1_ref, xw2_ref, xb2_ref,              # complexity_head
    thought_ref, unc_ref, scalars_ref,               # outputs
):
    x = x_ref[...]
    w_dt = bw1_ref.dtype  # matmul operand dtype (bf16 in the fast path)

    # ---- base_network: Linear(128,256) -> GELU -> Linear(256,128) ----------
    h = jnp.dot(x.astype(w_dt), bw1_ref[...],
                preferred_element_type=jnp.float32) + bb1_ref[...]
    h = _gelu_exact(h)
    base = jnp.dot(h.astype(w_dt), bw2_ref[...],
                   preferred_element_type=jnp.float32) + bb2_ref[...]
    thought_ref[...] = base

    # ---- critic on cat([x, base], -1): 256 -> 512 -> GELU -> 1 -> sigmoid --
    # split first layer: avoids materializing the lane-concatenated copy.
    c = (jnp.dot(x.astype(w_dt), cw1x_ref[...], preferred_element_type=jnp.float32)
         + jnp.dot(base.astype(w_dt), cw1b_ref[...], preferred_element_type=jnp.float32)
         + cb1_ref[...])
    c = _gelu_exact(c)
    # scalar head as VPU multiply + row reduction (no N=1 MXU pass)
    conf = jax.nn.sigmoid(
        jnp.sum(c * cw2_ref[...], axis=-1, keepdims=True) + cb2_ref[...])

    # ---- single-step LSTM with zero initial state ---------------------------
    # gates = base @ W_ih^T[:, i|g|o] + (b_ih + b_hh)[i|g|o]
    g = jnp.dot(base.astype(w_dt), lw_ref[...],
                preferred_element_type=jnp.float32) + lb_ref[...]
    i_g = jax.nn.sigmoid(g[:, 0:BASE_DIM])
    g_g = jnp.tanh(g[:, BASE_DIM:2 * BASE_DIM])
    o_g = jax.nn.sigmoid(g[:, 2 * BASE_DIM:3 * BASE_DIM])
    unc_ref[...] = o_g * jnp.tanh(i_g * g_g)

    # ---- complexity_head: Linear(128,64) -> GELU -> Linear(64,1) -> sigmoid -
    z = jnp.dot(base.astype(w_dt), xw1_ref[...],
                preferred_element_type=jnp.float32) + xb1_ref[...]
    z = _gelu_exact(z)
    comp = jax.nn.sigmoid(
        jnp.sum(z * xw2_ref[...], axis=-1, keepdims=True) + xb2_ref[...])

    # pack both scalar heads into one lane-dense (TB, 128) output tile:
    # lane 0 = confidence, lane 1 = complexity, rest = 0 (sliced off in wrapper).
    lane = jax.lax.broadcasted_iota(jnp.int32, scalars_ref.shape, 1)
    scalars_ref[...] = jnp.where(lane == 0, conf,
                                 jnp.where(lane == 1, comp, 0.0))


# -----------------------------------------------------------------------------
# Parameters (nn.Linear / nn.LSTM style init; weights stored as (in, out))
# -----------------------------------------------------------------------------
def init_params(key):
    def linear(k, fan_in, fan_out):
        k1, k2 = jax.random.split(k)
        bound = 1.0 / math.sqrt(fan_in)
        w = jax.random.uniform(k1, (fan_in, fan_out), jnp.float32, -bound, bound)
        b = jax.random.uniform(k2, (1, fan_out), jnp.float32, -bound, bound)
        return w, b

    keys = jax.random.split(key, 7)
    bw1, bb1 = linear(keys[0], BASE_DIM, HID1)
    bw2, bb2 = linear(keys[1], HID1, BASE_DIM)

    cw1, cb1 = linear(keys[2], 2 * BASE_DIM, CRIT_HID)
    cw1x, cw1b = cw1[:BASE_DIM], cw1[BASE_DIM:]      # split: x-half, base-half
    cw2_w, cb2 = linear(keys[3], CRIT_HID, 1)
    cw2 = cw2_w.T                                    # (1, 512) — VPU head weight

    # LSTM parameters (PyTorch init bound = 1/sqrt(hidden_size)); keep i, g, o
    # gate columns only (forget gate dead because c0 == 0; W_hh dead, h0 == 0).
    k_ih, k_bih, k_bhh = jax.random.split(keys[4], 3)
    lbound = 1.0 / math.sqrt(BASE_DIM)
    lw_full = jax.random.uniform(k_ih, (BASE_DIM, 4 * BASE_DIM), jnp.float32,
                                 -lbound, lbound)
    lb_full = (jax.random.uniform(k_bih, (1, 4 * BASE_DIM), jnp.float32, -lbound, lbound)
               + jax.random.uniform(k_bhh, (1, 4 * BASE_DIM), jnp.float32, -lbound, lbound))
    lw = jnp.concatenate([lw_full[:, :BASE_DIM], lw_full[:, 2 * BASE_DIM:]], axis=1)
    lb = jnp.concatenate([lb_full[:, :BASE_DIM], lb_full[:, 2 * BASE_DIM:]], axis=1)

    xw1, xb1 = linear(keys[5], BASE_DIM, COMP_HID)
    xw2_w, xb2 = linear(keys[6], COMP_HID, 1)
    xw2 = xw2_w.T                                    # (1, 64) — VPU head weight

    # TODO(synk): hypothesis_network is only used by self_correct (not forward)
    # and is therefore not materialized.
    return (bw1, bb1, bw2, bb2,
            cw1x, cw1b, cb1, cw2, cb2,
            lw, lb,
            xw1, xb1, xw2, xb2)


# -----------------------------------------------------------------------------
# Wrapper
# -----------------------------------------------------------------------------
def metacognition_forward(x, params, *, block_batch=256, weight_dtype=jnp.bfloat16):
    """x: (B, BASE_DIM) float32.  Returns dict of thought/confidence/uncertainty/complexity."""
    B, D = x.shape
    assert D == BASE_DIM

    # pad batch to a multiple of the tile (tile itself a multiple of 8 sublanes)
    tb = min(block_batch, _round_up(B, 8))
    Bp = _round_up(B, tb)
    if Bp != B:
        x = jnp.pad(x, ((0, Bp - B), (0, 0)))

    (bw1, bb1, bw2, bb2, cw1x, cw1b, cb1, cw2, cb2,
     lw, lb, xw1, xb1, xw2, xb2) = params

    # MXU operand weights -> bf16 (f32 accumulation); biases and the small
    # VPU-reduced head weights stay f32.
    mat = lambda w: w.astype(weight_dtype)
    weights = (mat(bw1), bb1, mat(bw2), bb2,
               mat(cw1x), mat(cw1b), cb1, cw2, cb2,
               mat(lw), lb,
               mat(xw1), xb1, xw2, xb2)

    row_spec = lambda feat: pl.BlockSpec((tb, feat), lambda i: (i, 0))
    # constant index_map: weights DMA'd once, VMEM-resident across the grid
    const_spec = lambda a: pl.BlockSpec(a.shape, lambda i: (0, 0))

    in_specs = [row_spec(BASE_DIM)] + [const_spec(w) for w in weights]
    out_specs = (row_spec(BASE_DIM), row_spec(BASE_DIM), row_spec(128))
    out_shape = (
        jax.ShapeDtypeStruct((Bp, BASE_DIM), jnp.float32),   # thought
        jax.ShapeDtypeStruct((Bp, BASE_DIM), jnp.float32),   # uncertainty
        jax.ShapeDtypeStruct((Bp, 128), jnp.float32),        # packed [conf, comp, 0...]
    )

    thought, uncertainty, scalars = pl.pallas_call(
        _metacog_kernel,
        out_shape=out_shape,
        grid=(Bp // tb,),
        in_specs=in_specs,
        out_specs=out_specs,
        compiler_params=pltpu.CompilerParams(
            dimension_semantics=("parallel",)),
    )(x, *weights)

    return {
        "thought": thought[:B],
        "confidence": scalars[:B, 0:1],
        "uncertainty": uncertainty[:B],
        "complexity": scalars[:B, 1:2],
    }


# -----------------------------------------------------------------------------
# Pure-JAX reference (for correctness check of the f32 path)
# -----------------------------------------------------------------------------
def _reference_forward(x, params):
    (bw1, bb1, bw2, bb2, cw1x, cw1b, cb1, cw2, cb2,
     lw, lb, xw1, xb1, xw2, xb2) = params
    dot = functools.partial(jnp.dot, precision=jax.lax.Precision.HIGHEST)
    h = _gelu_exact(dot(x, bw1) + bb1)
    base = dot(h, bw2) + bb2
    c = _gelu_exact(dot(x, cw1x) + dot(base, cw1b) + cb1)
    conf = jax.nn.sigmoid(dot(c, cw2.T) + cb2)
    g = dot(base, lw) + lb
    i_g = jax.nn.sigmoid(g[:, :BASE_DIM])
    g_g = jnp.tanh(g[:, BASE_DIM:2 * BASE_DIM])
    o_g = jax.nn.sigmoid(g[:, 2 * BASE_DIM:3 * BASE_DIM])
    unc = o_g * jnp.tanh(i_g * g_g)
    z = _gelu_exact(dot(base, xw1) + xb1)
    comp = jax.nn.sigmoid(dot(z, xw2.T) + xb2)
    return {"thought": base, "confidence": conf, "uncertainty": unc, "complexity": comp}


if __name__ == "__main__":
    key = jax.random.PRNGKey(0)
    k_param, k_x = jax.random.split(key)

    params = init_params(k_param)
    B = 12  # exercises the batch-padding path (not a multiple of 8)
    x = jax.random.normal(k_x, (B, BASE_DIM), dtype=jnp.float32)

    # exact-semantics path (f32 weights) checked against a pure-JAX reference
    out_f32 = metacognition_forward(x, params, weight_dtype=jnp.float32)
    jax.block_until_ready(out_f32)
    ref = _reference_forward(x, params)
    for name in ("thought", "confidence", "uncertainty", "complexity"):
        assert out_f32[name].shape == ref[name].shape
        assert jnp.allclose(out_f32[name], ref[name], atol=2e-3, rtol=2e-3), name

    # fast path (bf16 matmul weights, f32 accumulation)
    out = metacognition_forward(x, params)
    jax.block_until_ready(out)
    assert out["thought"].shape == (B, BASE_DIM)
    assert out["confidence"].shape == (B, 1)
    assert out["uncertainty"].shape == (B, BASE_DIM)
    assert out["complexity"].shape == (B, 1)
    for v in out.values():
        assert bool(jnp.all(jnp.isfinite(v)))

    print("KERNEL_OK")
</pallas_src>

<mosaic_0001>
module attributes {stable_mosaic.version = 11 : i64} {
  func.func @_metacog_kernel(%arg0: i32, %arg1: memref<16x128xf32, #tpu.memory_space<vmem>>, %arg2: memref<128x256xf32, #tpu.memory_space<vmem>>, %arg3: memref<1x256xf32, #tpu.memory_space<vmem>>, %arg4: memref<256x128xf32, #tpu.memory_space<vmem>>, %arg5: memref<1x128xf32, #tpu.memory_space<vmem>>, %arg6: memref<128x512xf32, #tpu.memory_space<vmem>>, %arg7: memref<128x512xf32, #tpu.memory_space<vmem>>, %arg8: memref<1x512xf32, #tpu.memory_space<vmem>>, %arg9: memref<1x512xf32, #tpu.memory_space<vmem>>, %arg10: memref<1x1xf32, #tpu.memory_space<vmem>>, %arg11: memref<128x384xf32, #tpu.memory_space<vmem>>, %arg12: memref<1x384xf32, #tpu.memory_space<vmem>>, %arg13: memref<128x64xf32, #tpu.memory_space<vmem>>, %arg14: memref<1x64xf32, #tpu.memory_space<vmem>>, %arg15: memref<1x64xf32, #tpu.memory_space<vmem>>, %arg16: memref<1x1xf32, #tpu.memory_space<vmem>>, %arg17: memref<16x128xf32, #tpu.memory_space<vmem>>, %arg18: memref<16x128xf32, #tpu.memory_space<vmem>>, %arg19: memref<16x128xf32, #tpu.memory_space<vmem>>) attributes {dimension_semantics = [#tpu.dimension_semantics<parallel>], iteration_bounds = array<i64: 1>, scalar_prefetch = 0 : i64, scratch_operands = 0 : i64, tpu.core_type = #tpu.core_type<tc>, window_params = [{transform_indices = @transform_0, window_bounds = array<i64: 16, 128>}, {pipeline_mode = #tpu.pipeline_mode<synchronous>, transform_indices = @transform_1, window_bounds = array<i64: 128, 256>}, {pipeline_mode = #tpu.pipeline_mode<synchronous>, transform_indices = @transform_2, window_bounds = array<i64: 1, 256>}, {pipeline_mode = #tpu.pipeline_mode<synchronous>, transform_indices = @transform_3, window_bounds = array<i64: 256, 128>}, {pipeline_mode = #tpu.pipeline_mode<synchronous>, transform_indices = @transform_4, window_bounds = array<i64: 1, 128>}, {pipeline_mode = #tpu.pipeline_mode<synchronous>, transform_indices = @transform_5, window_bounds = array<i64: 128, 512>}, {pipeline_mode = #tpu.pipeline_mode<synchronous>, transform_indices = @transform_6, window_bounds = array<i64: 128, 512>}, {pipeline_mode = #tpu.pipeline_mode<synchronous>, transform_indices = @transform_7, window_bounds = array<i64: 1, 512>}, {pipeline_mode = #tpu.pipeline_mode<synchronous>, transform_indices = @transform_8, window_bounds = array<i64: 1, 512>}, {pipeline_mode = #tpu.pipeline_mode<synchronous>, transform_indices = @transform_9, window_bounds = array<i64: 1, 1>}, {pipeline_mode = #tpu.pipeline_mode<synchronous>, transform_indices = @transform_10, window_bounds = array<i64: 128, 384>}, {pipeline_mode = #tpu.pipeline_mode<synchronous>, transform_indices = @transform_11, window_bounds = array<i64: 1, 384>}, {pipeline_mode = #tpu.pipeline_mode<synchronous>, transform_indices = @transform_12, window_bounds = array<i64: 128, 64>}, {pipeline_mode = #tpu.pipeline_mode<synchronous>, transform_indices = @transform_13, window_bounds = array<i64: 1, 64>}, {pipeline_mode = #tpu.pipeline_mode<synchronous>, transform_indices = @transform_14, window_bounds = array<i64: 1, 64>}, {pipeline_mode = #tpu.pipeline_mode<synchronous>, transform_indices = @transform_15, window_bounds = array<i64: 1, 1>}, {transform_indices = @transform_16, window_bounds = array<i64: 16, 128>}, {transform_indices = @transform_17, window_bounds = array<i64: 16, 128>}, {transform_indices = @transform_18, window_bounds = array<i64: 16, 128>}]} {
    %c0 = arith.constant 0 : index
    %c0_0 = arith.constant 0 : index
    %0 = vector.load %arg1[%c0, %c0_0] : memref<16x128xf32, #tpu.memory_space<vmem>>, vector<16x128xf32>
    %c0_1 = arith.constant 0 : index
    %c0_2 = arith.constant 0 : index
    %1 = vector.load %arg2[%c0_1, %c0_2] : memref<128x256xf32, #tpu.memory_space<vmem>>, vector<128x256xf32>
    %cst = arith.constant dense<0.000000e+00> : vector<16x256xf32>
    %2 = tpu.matmul %0, %1, %cst {dimension_numbers = #tpu.dot_dimension_numbers<[1], [0], [0], [1], [0, 0, 1, 1], [], []>} : vector<16x128xf32>, vector<128x256xf32>, vector<16x256xf32> -> vector<16x256xf32>
    %c0_3 = arith.constant 0 : index
    %c0_4 = arith.constant 0 : index
    %3 = vector.load %arg3[%c0_3, %c0_4] : memref<1x256xf32, #tpu.memory_space<vmem>>, vector<1x256xf32>
    %4 = vector.broadcast %3 : vector<1x256xf32> to vector<16x256xf32>
    %5 = arith.addf %2, %4 : vector<16x256xf32>
    %cst_5 = arith.constant 5.000000e-01 : f32
    %6 = vector.broadcast %cst_5 : f32 to vector<16x256xf32>
    %7 = arith.mulf %6, %5 : vector<16x256xf32>
    %cst_6 = arith.constant 0.707106769 : f32
    %8 = vector.broadcast %cst_6 : f32 to vector<16x256xf32>
    %9 = arith.mulf %5, %8 : vector<16x256xf32>
    %10 = math.erf %9 : vector<16x256xf32>
    %cst_7 = arith.constant 1.000000e+00 : f32
    %11 = vector.broadcast %cst_7 : f32 to vector<16x256xf32>
    %12 = arith.addf %11, %10 : vector<16x256xf32>
    %13 = arith.mulf %7, %12 : vector<16x256xf32>
    %c0_8 = arith.constant 0 : index
    %c0_9 = arith.constant 0 : index
    %14 = vector.load %arg4[%c0_8, %c0_9] : memref<256x128xf32, #tpu.memory_space<vmem>>, vector<256x128xf32>
    %cst_10 = arith.constant dense<0.000000e+00> : vector<16x128xf32>
    %15 = tpu.matmul %13, %14, %cst_10 {dimension_numbers = #tpu.dot_dimension_numbers<[1], [0], [0], [1], [0, 0, 1, 1], [], []>} : vector<16x256xf32>, vector<256x128xf32>, vector<16x128xf32> -> vector<16x128xf32>
    %c0_11 = arith.constant 0 : index
    %c0_12 = arith.constant 0 : index
    %16 = vector.load %arg5[%c0_11, %c0_12] : memref<1x128xf32, #tpu.memory_space<vmem>>, vector<1x128xf32>
    %17 = vector.broadcast %16 : vector<1x128xf32> to vector<16x128xf32>
    %18 = arith.addf %15, %17 : vector<16x128xf32>
    %c0_13 = arith.constant 0 : index
    %c0_14 = arith.constant 0 : index
    %19 = vector.load %arg17[%c0_13, %c0_14] : memref<16x128xf32, #tpu.memory_space<vmem>>, vector<16x128xf32>
    tpu.vector_store %arg17[%c0_13, %c0_14], %18 {strides = array<i32>} : memref<16x128xf32, #tpu.memory_space<vmem>>, vector<16x128xf32>,
    %c0_15 = arith.constant 0 : index
    %c0_16 = arith.constant 0 : index
    %20 = vector.load %arg6[%c0_15, %c0_16] : memref<128x512xf32, #tpu.memory_space<vmem>>, vector<128x512xf32>
    %cst_17 = arith.constant dense<0.000000e+00> : vector<16x512xf32>
    %21 = tpu.matmul %0, %20, %cst_17 {dimension_numbers = #tpu.dot_dimension_numbers<[1], [0], [0], [1], [0, 0, 1, 1], [], []>} : vector<16x128xf32>, vector<128x512xf32>, vector<16x512xf32> -> vector<16x512xf32>
    %c0_18 = arith.constant 0 : index
    %c0_19 = arith.constant 0 : index
    %22 = vector.load %arg7[%c0_18, %c0_19] : memref<128x512xf32, #tpu.memory_space<vmem>>, vector<128x512xf32>
    %cst_20 = arith.constant dense<0.000000e+00> : vector<16x512xf32>
    %23 = tpu.matmul %18, %22, %cst_20 {dimension_numbers = #tpu.dot_dimension_numbers<[1], [0], [0], [1], [0, 0, 1, 1], [], []>} : vector<16x128xf32>, vector<128x512xf32>, vector<16x512xf32> -> vector<16x512xf32>
    %24 = arith.addf %21, %23 : vector<16x512xf32>
    %c0_21 = arith.constant 0 : index
    %c0_22 = arith.constant 0 : index
    %25 = vector.load %arg8[%c0_21, %c0_22] : memref<1x512xf32, #tpu.memory_space<vmem>>, vector<1x512xf32>
    %26 = vector.broadcast %25 : vector<1x512xf32> to vector<16x512xf32>
    %27 = arith.addf %24, %26 : vector<16x512xf32>
    %cst_23 = arith.constant 5.000000e-01 : f32
    %28 = vector.broadcast %cst_23 : f32 to vector<16x512xf32>
    %29 = arith.mulf %28, %27 : vector<16x512xf32>
    %cst_24 = arith.constant 0.707106769 : f32
    %30 = vector.broadcast %cst_24 : f32 to vector<16x512xf32>
    %31 = arith.mulf %27, %30 : vector<16x512xf32>
    %32 = math.erf %31 : vector<16x512xf32>
    %cst_25 = arith.constant 1.000000e+00 : f32
    %33 = vector.broadcast %cst_25 : f32 to vector<16x512xf32>
    %34 = arith.addf %33, %32 : vector<16x512xf32>
    %35 = arith.mulf %29, %34 : vector<16x512xf32>
    %c0_26 = arith.constant 0 : index
    %c0_27 = arith.constant 0 : index
    %36 = vector.load %arg9[%c0_26, %c0_27] : memref<1x512xf32, #tpu.memory_space<vmem>>, vector<1x512xf32>
    %37 = vector.broadcast %36 : vector<1x512xf32> to vector<16x512xf32>
    %38 = arith.mulf %35, %37 : vector<16x512xf32>
    %cst_28 = arith.constant dense<0.000000e+00> : vector<16xf32>
    %39 = vector.multi_reduction <add>, %38, %cst_28 [1] : vector<16x512xf32> to vector<16xf32>
    %40 = vector.shape_cast %39 : vector<16xf32> to vector<16x1xf32>
    %c0_29 = arith.constant 0 : index
    %c0_30 = arith.constant 0 : index
    %41 = vector.load %arg10[%c0_29, %c0_30] : memref<1x1xf32, #tpu.memory_space<vmem>>, vector<1x1xf32>
    %42 = vector.broadcast %41 : vector<1x1xf32> to vector<16x1xf32>
    %43 = arith.addf %40, %42 : vector<16x1xf32>
    %44 = arith.negf %43 : vector<16x1xf32>
    %45 = math.exp %44 : vector<16x1xf32>
    %cst_31 = arith.constant 1.000000e+00 : f32
    %46 = vector.broadcast %cst_31 : f32 to vector<16x1xf32>
    %47 = arith.addf %46, %45 : vector<16x1xf32>
    %48 = arith.divf %46, %47 : vector<16x1xf32>
    %c0_32 = arith.constant 0 : index
    %c0_33 = arith.constant 0 : index
    %49 = vector.load %arg11[%c0_32, %c0_33] : memref<128x384xf32, #tpu.memory_space<vmem>>, vector<128x384xf32>
    %cst_34 = arith.constant dense<0.000000e+00> : vector<16x384xf32>
    %50 = tpu.matmul %18, %49, %cst_34 {dimension_numbers = #tpu.dot_dimension_numbers<[1], [0], [0], [1], [0, 0, 1, 1], [], []>} : vector<16x128xf32>, vector<128x384xf32>, vector<16x384xf32> -> vector<16x384xf32>
    %c0_35 = arith.constant 0 : index
    %c0_36 = arith.constant 0 : index
    %51 = vector.load %arg12[%c0_35, %c0_36] : memref<1x384xf32, #tpu.memory_space<vmem>>, vector<1x384xf32>
    %52 = vector.broadcast %51 : vector<1x384xf32> to vector<16x384xf32>
    %53 = arith.addf %50, %52 : vector<16x384xf32>
    %54 = vector.extract_strided_slice %53 {offsets = [0, 0], sizes = [16, 128], strides = [1, 1]} : vector<16x384xf32> to vector<16x128xf32>
    %55 = arith.negf %54 : vector<16x128xf32>
    %56 = math.exp %55 : vector<16x128xf32>
    %cst_37 = arith.constant 1.000000e+00 : f32
    %57 = vector.broadcast %cst_37 : f32 to vector<16x128xf32>
    %58 = arith.addf %57, %56 : vector<16x128xf32>
    %59 = arith.divf %57, %58 : vector<16x128xf32>
    %60 = vector.extract_strided_slice %53 {offsets = [0, 128], sizes = [16, 128], strides = [1, 1]} : vector<16x384xf32> to vector<16x128xf32>
    %61 = math.tanh %60 : vector<16x128xf32>
    %62 = vector.extract_strided_slice %53 {offsets = [0, 256], sizes = [16, 128], strides = [1, 1]} : vector<16x384xf32> to vector<16x128xf32>
    %63 = arith.negf %62 : vector<16x128xf32>
    %64 = math.exp %63 : vector<16x128xf32>
    %cst_38 = arith.constant 1.000000e+00 : f32
    %65 = vector.broadcast %cst_38 : f32 to vector<16x128xf32>
    %66 = arith.addf %65, %64 : vector<16x128xf32>
    %67 = arith.divf %65, %66 : vector<16x128xf32>
    %68 = arith.mulf %59, %61 : vector<16x128xf32>
    %69 = math.tanh %68 : vector<16x128xf32>
    %70 = arith.mulf %67, %69 : vector<16x128xf32>
    %c0_39 = arith.constant 0 : index
    %c0_40 = arith.constant 0 : index
    %71 = vector.load %arg18[%c0_39, %c0_40] : memref<16x128xf32, #tpu.memory_space<vmem>>, vector<16x128xf32>
    tpu.vector_store %arg18[%c0_39, %c0_40], %70 {strides = array<i32>} : memref<16x128xf32, #tpu.memory_space<vmem>>, vector<16x128xf32>,
    %c0_41 = arith.constant 0 : index
    %c0_42 = arith.constant 0 : index
    %72 = vector.load %arg13[%c0_41, %c0_42] : memref<128x64xf32, #tpu.memory_space<vmem>>, vector<128x64xf32>
    %cst_43 = arith.constant dense<0.000000e+00> : vector<16x64xf32>
    %73 = tpu.matmul %18, %72, %cst_43 {dimension_numbers = #tpu.dot_dimension_numbers<[1], [0], [0], [1], [0, 0, 1, 1], [], []>} : vector<16x128xf32>, vector<128x64xf32>, vector<16x64xf32> -> vector<16x64xf32>
    %c0_44 = arith.constant 0 : index
    %c0_45 = arith.constant 0 : index
    %74 = vector.load %arg14[%c0_44, %c0_45] : memref<1x64xf32, #tpu.memory_space<vmem>>, vector<1x64xf32>
    %75 = vector.broadcast %74 : vector<1x64xf32> to vector<16x64xf32>
    %76 = arith.addf %73, %75 : vector<16x64xf32>
    %cst_46 = arith.constant 5.000000e-01 : f32
    %77 = vector.broadcast %cst_46 : f32 to vector<16x64xf32>
    %78 = arith.mulf %77, %76 : vector<16x64xf32>
    %cst_47 = arith.constant 0.707106769 : f32
    %79 = vector.broadcast %cst_47 : f32 to vector<16x64xf32>
    %80 = arith.mulf %76, %79 : vector<16x64xf32>
    %81 = math.erf %80 : vector<16x64xf32>
    %cst_48 = arith.constant 1.000000e+00 : f32
    %82 = vector.broadcast %cst_48 : f32 to vector<16x64xf32>
    %83 = arith.addf %82, %81 : vector<16x64xf32>
    %84 = arith.mulf %78, %83 : vector<16x64xf32>
    %c0_49 = arith.constant 0 : index
    %c0_50 = arith.constant 0 : index
    %85 = vector.load %arg15[%c0_49, %c0_50] : memref<1x64xf32, #tpu.memory_space<vmem>>, vector<1x64xf32>
    %86 = vector.broadcast %85 : vector<1x64xf32> to vector<16x64xf32>
    %87 = arith.mulf %84, %86 : vector<16x64xf32>
    %cst_51 = arith.constant dense<0.000000e+00> : vector<16xf32>
    %88 = vector.multi_reduction <add>, %87, %cst_51 [1] : vector<16x64xf32> to vector<16xf32>
    %89 = vector.shape_cast %88 : vector<16xf32> to vector<16x1xf32>
    %c0_52 = arith.constant 0 : index
    %c0_53 = arith.constant 0 : index
    %90 = vector.load %arg16[%c0_52, %c0_53] : memref<1x1xf32, #tpu.memory_space<vmem>>, vector<1x1xf32>
    %91 = vector.broadcast %90 : vector<1x1xf32> to vector<16x1xf32>
    %92 = arith.addf %89, %91 : vector<16x1xf32>
    %93 = arith.negf %92 : vector<16x1xf32>
    %94 = math.exp %93 : vector<16x1xf32>
    %cst_54 = arith.constant 1.000000e+00 : f32
    %95 = vector.broadcast %cst_54 : f32 to vector<16x1xf32>
    %96 = arith.addf %95, %94 : vector<16x1xf32>
    %97 = arith.divf %95, %96 : vector<16x1xf32>
    %98 = tpu.iota {dimensions = array<i32: 1>} : vector<16x128xi32>
    %c0_i32 = arith.constant 0 : i32
    %99 = vector.broadcast %c0_i32 : i32 to vector<16x128xi32>
    %100 = arith.cmpi eq, %98, %99 : vector<16x128xi32>
    %c1_i32 = arith.constant 1 : i32
    %101 = vector.broadcast %c1_i32 : i32 to vector<16x128xi32>
    %102 = arith.cmpi eq, %98, %101 : vector<16x128xi32>
    %cst_55 = arith.constant 0.000000e+00 : f32
    %103 = vector.shape_cast %97 : vector<16x1xf32> to vector<16x1xf32>
    %104 = vector.broadcast %103 : vector<16x1xf32> to vector<16x128xf32>
    %105 = vector.broadcast %cst_55 : f32 to vector<16x128xf32>
    %106 = arith.select %102, %104, %105 : vector<16x128xi1>, vector<16x128xf32>
    %107 = vector.shape_cast %48 : vector<16x1xf32> to vector<16x1xf32>
    %108 = vector.broadcast %107 : vector<16x1xf32> to vector<16x128xf32>
    %109 = arith.select %100, %108, %106 : vector<16x128xi1>, vector<16x128xf32>
    %c0_56 = arith.constant 0 : index
    %c0_57 = arith.constant 0 : index
    %110 = vector.load %arg19[%c0_56, %c0_57] : memref<16x128xf32, #tpu.memory_space<vmem>>, vector<16x128xf32>
    tpu.vector_store %arg19[%c0_56, %c0_57], %109 {strides = array<i32>} : memref<16x128xf32, #tpu.memory_space<vmem>>, vector<16x128xf32>,
    return
  }
  func.func @transform_0(%arg0: i32) -> (i32, i32) {
    %c0_i32 = arith.constant 0 : i32
    %c0_i32_0 = arith.constant 0 : i32
    return %arg0, %c0_i32 : i32, i32
  }
  func.func @transform_1(%arg0: i32) -> (i32, i32) {
    %c0_i32 = arith.constant 0 : i32
    %c0_i32_0 = arith.constant 0 : i32
    %c0_i32_1 = arith.constant 0 : i32
    return %c0_i32, %c0_i32_0 : i32, i32
  }
  func.func @transform_2(%arg0: i32) -> (i32, i32) {
    %c0_i32 = arith.constant 0 : i32
    %c0_i32_0 = arith.constant 0 : i32
    %c0_i32_1 = arith.constant 0 : i32
    return %c0_i32, %c0_i32_0 : i32, i32
  }
  func.func @transform_3(%arg0: i32) -> (i32, i32) {
    %c0_i32 = arith.constant 0 : i32
    %c0_i32_0 = arith.constant 0 : i32
    %c0_i32_1 = arith.constant 0 : i32
    return %c0_i32, %c0_i32_0 : i32, i32
  }
  func.func @transform_4(%arg0: i32) -> (i32, i32) {
    %c0_i32 = arith.constant 0 : i32
    %c0_i32_0 = arith.constant 0 : i32
    %c0_i32_1 = arith.constant 0 : i32
    return %c0_i32, %c0_i32_0 : i32, i32
  }
  func.func @transform_5(%arg0: i32) -> (i32, i32) {
    %c0_i32 = arith.constant 0 : i32
    %c0_i32_0 = arith.constant 0 : i32
    %c0_i32_1 = arith.constant 0 : i32
    return %c0_i32, %c0_i32_0 : i32, i32
  }
  func.func @transform_6(%arg0: i32) -> (i32, i32) {
    %c0_i32 = arith.constant 0 : i32
    %c0_i32_0 = arith.constant 0 : i32
    %c0_i32_1 = arith.constant 0 : i32
    return %c0_i32, %c0_i32_0 : i32, i32
  }
  func.func @transform_7(%arg0: i32) -> (i32, i32) {
    %c0_i32 = arith.constant 0 : i32
    %c0_i32_0 = arith.constant 0 : i32
    %c0_i32_1 = arith.constant 0 : i32
    return %c0_i32, %c0_i32_0 : i32, i32
  }
  func.func @transform_8(%arg0: i32) -> (i32, i32) {
    %c0_i32 = arith.constant 0 : i32
    %c0_i32_0 = arith.constant 0 : i32
    %c0_i32_1 = arith.constant 0 : i32
    return %c0_i32, %c0_i32_0 : i32, i32
  }
  func.func @transform_9(%arg0: i32) -> (i32, i32) {
    %c0_i32 = arith.constant 0 : i32
    %c0_i32_0 = arith.constant 0 : i32
    %c0_i32_1 = arith.constant 0 : i32
    return %c0_i32, %c0_i32_0 : i32, i32
  }
  func.func @transform_10(%arg0: i32) -> (i32, i32) {
    %c0_i32 = arith.constant 0 : i32
    %c0_i32_0 = arith.constant 0 : i32
    %c0_i32_1 = arith.constant 0 : i32
    return %c0_i32, %c0_i32_0 : i32, i32
  }
  func.func @transform_11(%arg0: i32) -> (i32, i32) {
    %c0_i32 = arith.constant 0 : i32
    %c0_i32_0 = arith.constant 0 : i32
    %c0_i32_1 = arith.constant 0 : i32
    return %c0_i32, %c0_i32_0 : i32, i32
  }
  func.func @transform_12(%arg0: i32) -> (i32, i32) {
    %c0_i32 = arith.constant 0 : i32
    %c0_i32_0 = arith.constant 0 : i32
    %c0_i32_1 = arith.constant 0 : i32
    return %c0_i32, %c0_i32_0 : i32, i32
  }
  func.func @transform_13(%arg0: i32) -> (i32, i32) {
    %c0_i32 = arith.constant 0 : i32
    %c0_i32_0 = arith.constant 0 : i32
    %c0_i32_1 = arith.constant 0 : i32
    return %c0_i32, %c0_i32_0 : i32, i32
  }
  func.func @transform_14(%arg0: i32) -> (i32, i32) {
    %c0_i32 = arith.constant 0 : i32
    %c0_i32_0 = arith.constant 0 : i32
    %c0_i32_1 = arith.constant 0 : i32
    return %c0_i32, %c0_i32_0 : i32, i32
  }
  func.func @transform_15(%arg0: i32) -> (i32, i32) {
    %c0_i32 = arith.constant 0 : i32
    %c0_i32_0 = arith.constant 0 : i32
    %c0_i32_1 = arith.constant 0 : i32
    return %c0_i32, %c0_i32_0 : i32, i32
  }
  func.func @transform_16(%arg0: i32) -> (i32, i32) {
    %c0_i32 = arith.constant 0 : i32
    %c0_i32_0 = arith.constant 0 : i32
    return %arg0, %c0_i32 : i32, i32
  }
  func.func @transform_17(%arg0: i32) -> (i32, i32) {
    %c0_i32 = arith.constant 0 : i32
    %c0_i32_0 = arith.constant 0 : i32
    return %arg0, %c0_i32 : i32, i32
  }
  func.func @transform_18(%arg0: i32) -> (i32, i32) {
    %c0_i32 = arith.constant 0 : i32
    %c0_i32_0 = arith.constant 0 : i32
    return %arg0, %c0_i32 : i32, i32
  }
}

</mosaic_0001>

<bundles_post_ra>
// kernel: tpu_custom_call.1
= control target key start
LH: loop header
LB: loop body
LE: loop exit
PB: predicated region body
PF: predicated region fallthrough
CT: control target
= control target key end

     0   :  { %s2541_s0 = inlined_call_operand.vmem [shape: f32[16,128], index: 0, kind: input, shape index: {}]   ;;  %s2542_s1 = inlined_call_operand.hbm [shape: f32[128,256], index: 1, kind: input, shape index: {}]   ;;  %s2543_s2 = inlined_call_operand.vmem [shape: f32[1,256], index: 2, kind: input, shape index: {}]   ;;  %s2544_s3 = inlined_call_operand.hbm [shape: f32[256,128], index: 3, kind: input, shape index: {}]   ;;  %s2545_s4 = inlined_call_operand.vmem [shape: f32[1,128], index: 4, kind: input, shape index: {}]   ;;  %s2546_s5 = inlined_call_operand.hbm [shape: f32[128,512], index: 5, kind: input, shape index: {}]   ;;  %s2547_s6 = inlined_call_operand.hbm [shape: f32[128,512], index: 6, kind: input, shape index: {}]   ;;  %s2548_s7 = inlined_call_operand.vmem [shape: f32[1,512], index: 7, kind: input, shape index: {}]   ;;  %s2549_s8 = inlined_call_operand.vmem [shape: f32[1,512], index: 8, kind: input, shape index: {}]   ;;  %s2550_s9 = inlined_call_operand.<no memory space> [shape: f32[1,1], index: 9, kind: input, shape index: {}]   ;;  %s2551_s10 = inlined_call_operand.hbm [shape: f32[128,384], index: 10, kind: input, shape index: {}]   ;;  %s2552_s11 = inlined_call_operand.vmem [shape: f32[1,384], index: 11, kind: input, shape index: {}]   ;;  %s2553_s12 = inlined_call_operand.vmem [shape: f32[128,64], index: 12, kind: input, shape index: {}]   ;;  %s2554_s13 = inlined_call_operand.vmem [shape: f32[1,64], index: 13, kind: input, shape index: {}]   ;;  %s2555_s14 = inlined_call_operand.vmem [shape: f32[1,64], index: 14, kind: input, shape index: {}]   ;;  %s2556_s16 = inlined_call_operand.hbm [shape: f32[16,128], index: 16, kind: output, shape index: {0}]   ;;  %s2557_s17 = inlined_call_operand.hbm [shape: f32[16,128], index: 17, kind: output, shape index: {1}]   ;;  %s2558_s18 = inlined_call_operand.hbm [shape: f32[16,128], index: 18, kind: output, shape index: {2}]   ;;  %s2559_s15 = inlined_call_operand.<no memory space> [shape: f32[1,1], index: 15, kind: input, shape index: {}]  }
   0x1   :  { %2566 = sst [smem:[#allocation22_spill]] %s2541_s0  ;;  %v24_v0 = vstv %s2550_s9  ;;  %v26_v1 = vstv %s2559_s15 }
   0x2   :  { %2567 = sst [smem:[#allocation23_spill]] %s2542_s1  ;;  %25 = vst [vmem:[#allocation2] sm:$0x1] %v24_v0  ;;  %27 = vst [vmem:[#allocation3] sm:$0x1] %v26_v1 }
   0x3   :  { %2568 = sst [smem:[#allocation24_spill]] %s2543_s2 }
   0x4   :  { %28 = vsyncpa [#allocation5], 0 }
   0x5   :  { %29 = vsyncpa [#allocation8], 0 }
   0x6   :  { %30 = vsyncpa [#allocation11], 0 }
   0x7   :  { %31 = vsyncpa [#allocation6], 0 }
   0x8   :  { %32 = vsyncpa [#allocation15], 0  ;;  %s2159_s0 = smov [#allocation7]   ;;  %s1973_s21 = scalar_lea.hbm %s2544_s3, 4096 }
   0x9   :  { %s54_s19 = sshll.u32 %s2159_s0, 4  ;;  %p1974_p0 = scmp.ne.s32.totalorder %s2544_s3, %s1973_s21  ;;  %s55_s19 = int_to_ptr.vmem [resolvable:$true] %s54_s19 }
   0xa   :  { %p1977_p1 = scmp.lt.u32.totalorder %s1973_s21, %s2544_s3 }
   0xc   :  { %p1979_p2 = pnand %p1977_p1, %p1974_p0 }
   0xe   :  { %1982 = shalt.err (!%p1979_p2)
}
   0xf   :  { %s1983_s23 = scalar_lea.vmem %s55_s19, 4096  ;;  %p1988_p4 = scmp.lt.s32.totalorder %s55_s19, %s55_s19 }
  0x10   :  { %p1984_p3 = scmp.ne.s32.totalorder %s55_s19, %s1983_s23  ;;  %p1989_p5 = scmp.lt.s32.totalorder %s1983_s23, %s1983_s23 }
  0x12   :  { %p1990_p6 = por %p1989_p5, %p1988_p4 }
  0x14   :  { %p1991_p7 = pnand %p1990_p6, %p1984_p3 }
  0x16   :  { %1994 = shalt.err (!%p1991_p7)
}
  0x17   :  { %s2562_s24 = smov 128   ;;  %s2564_s25 = smov 8  }
  0x18   :  { %60 = dma.hbm_to_vmem [thread:$0]  %s2544_s3, 4096, %s55_s19, [#allocation8], %s2562_s24, %s2562_s24, %s2564_s25  }
  0x19   :  { %s2162_s28 = smov [#allocation10]   ;;  %s2163_s30 = smov [#allocation4]  }
  0x1a   :  { %s80_s29 = sshll.u32 %s2162_s28, 4  ;;  %s40_s0 = sshll.u32 %s2163_s30, 4  ;;  %s81_s29 = int_to_ptr.vmem [resolvable:$true] %s80_s29  ;;  %s41_s0 = int_to_ptr.vmem [resolvable:$true] %s40_s0 }
  0x1b   :  { %s1995_s21 = scalar_lea.hbm %s2547_s6, 8192 }
  0x1c   :  { %p1996_p8 = scmp.ne.s32.totalorder %s2547_s6, %s1995_s21  ;;  %p1999_p9 = scmp.lt.u32.totalorder %s1995_s21, %s2547_s6 }
  0x1e   :  { %p2001_p10 = pnand %p1999_p9, %p1996_p8 }
  0x20   :  { %2004 = shalt.err (!%p2001_p10)
}
  0x21   :  { %s2005_s3 = scalar_lea.vmem %s81_s29, 8192  ;;  %p2010_p12 = scmp.lt.s32.totalorder %s81_s29, %s81_s29 }
  0x22   :  { %p2006_p11 = scmp.ne.s32.totalorder %s81_s29, %s2005_s3  ;;  %p2011_p13 = scmp.lt.s32.totalorder %s2005_s3, %s2005_s3 }
  0x24   :  { %p2012_p0 = por %p2011_p13, %p2010_p12 }
  0x26   :  { %p2013_p1 = pnand %p2012_p0, %p2006_p11 }
  0x28   :  { %2016 = shalt.err (!%p2013_p1)
}
  0x29   :  { %s2164_s19 = smov 512   ;;  %s2165_s23 = smov 32  }
  0x2a   :  { %86 = dma.hbm_to_vmem [thread:$0]  %s2547_s6, 8192, %s81_s29, [#allocation11], %s2164_s19, %s2164_s19, %s2165_s23  }
  0x2b   :  { %s2569_s1 = sld [smem:[#allocation23_spill]] }
  0x31   :  { %s2017_s20 = scalar_lea.hbm %s2569_s1, 4096 }
  0x32   :  { %p2018_p2 = scmp.ne.s32.totalorder %s2569_s1, %s2017_s20  ;;  %p2021_p3 = scmp.lt.u32.totalorder %s2017_s20, %s2569_s1 }
  0x34   :  { %p2023_p4 = pnand %p2021_p3, %p2018_p2 }
  0x36   :  { %2026 = shalt.err (!%p2023_p4)
}
  0x37   :  { %s2027_s15 = scalar_lea.vmem %s41_s0, 4096  ;;  %p2032_p6 = scmp.lt.s32.totalorder %s41_s0, %s41_s0 }
  0x38   :  { %p2028_p5 = scmp.ne.s32.totalorder %s41_s0, %s2027_s15  ;;  %p2033_p7 = scmp.lt.s32.totalorder %s2027_s15, %s2027_s15 }
  0x3a   :  { %p2034_p8 = por %p2033_p7, %p2032_p6 }
  0x3c   :  { %p2035_p9 = pnand %p2034_p8, %p2028_p5 }
  0x3e   :  { %2038 = shalt.err (!%p2035_p9)
}
  0x3f   :  { %s2166_s6 = smov 256   ;;  %s2167_s29 = smov 16  }
  0x40   :  { %46 = dma.hbm_to_vmem [thread:$0]  %s2569_s1, 4096, %s41_s0, [#allocation5], %s2166_s6, %s2166_s6, %s2167_s29  }
  0x41   :  { %s2168_s27 = smov [#allocation9]   ;;  %s2169_s30 = smov [#allocation12]  }
  0x42   :  { %s68_s28 = sshll.u32 %s2168_s27, 4  ;;  %s98_s20 = sshll.u32 %s2169_s30, 4  ;;  %s69_s28 = int_to_ptr.vmem [resolvable:$true] %s68_s28  ;;  %s99_s20 = int_to_ptr.vmem [resolvable:$true] %s98_s20 }
  0x43   :  { %s2039_s9 = scalar_lea.hbm %s2546_s5, 8192 }
  0x44   :  { %p2040_p10 = scmp.ne.s32.totalorder %s2546_s5, %s2039_s9  ;;  %p2043_p11 = scmp.lt.u32.totalorder %s2039_s9, %s2546_s5 }
  0x46   :  { %p2045_p12 = pnand %p2043_p11, %p2040_p10 }
  0x48   :  { %2048 = shalt.err (!%p2045_p12)
}
  0x49   :  { %s2049_s0 = scalar_lea.vmem %s69_s28, 8192  ;;  %p2054_p0 = scmp.lt.s32.totalorder %s69_s28, %s69_s28 }
  0x4a   :  { %p2050_p13 = scmp.ne.s32.totalorder %s69_s28, %s2049_s0  ;;  %p2055_p1 = scmp.lt.s32.totalorder %s2049_s0, %s2049_s0 }
  0x4c   :  { %p2056_p2 = por %p2055_p1, %p2054_p0 }
  0x4e   :  { %p2057_p3 = pnand %p2056_p2, %p2050_p13 }
  0x50   :  { %2060 = shalt.err (!%p2057_p3)
}
  0x51   :  { %74 = dma.hbm_to_vmem [thread:$0]  %s2546_s5, 8192, %s69_s28, [#allocation8], %s2164_s19, %s2164_s19, %s2165_s23  }
  0x52   :  { %s2061_s25 = scalar_lea.hbm %s2551_s10, 6144 }
  0x53   :  { %p2062_p4 = scmp.ne.s32.totalorder %s2551_s10, %s2061_s25  ;;  %p2065_p5 = scmp.lt.u32.totalorder %s2061_s25, %s2551_s10 }
  0x55   :  { %p2067_p6 = pnand %p2065_p5, %p2062_p4 }
  0x57   :  { %2070 = shalt.err (!%p2067_p6)
}
  0x58   :  { %s2071_s21 = scalar_lea.vmem %s99_s20, 6144  ;;  %p2076_p8 = scmp.lt.s32.totalorder %s99_s20, %s99_s20 }
  0x59   :  { %p2072_p7 = scmp.ne.s32.totalorder %s99_s20, %s2071_s21  ;;  %p2077_p9 = scmp.lt.s32.totalorder %s2071_s21, %s2071_s21 }
  0x5b   :  { %p2078_p10 = por %p2077_p9, %p2076_p8 }
  0x5d   :  { %p2079_p11 = pnand %p2078_p10, %p2072_p7 }
  0x5f   :  { %2082 = shalt.err (!%p2079_p11)
}
  0x60   :  { %s2170_s5 = smov 384   ;;  %s2171_s19 = smov 24  }
  0x61   :  { %104 = dma.hbm_to_vmem [thread:$0]  %s2551_s10, 6144, %s99_s20, [#allocation11], %s2170_s5, %s2170_s5, %s2171_s19  }
  0x62   :  { %2149 = dma.done.wait [#allocation5], 4096  }
  0x63   :  { %2150 = vsyncadd [#allocation5], 4294963200 }
  0x64   :  { %2151 = dma.done.wait [#allocation8], 12288  }
  0x65   :  { %2152 = vsyncadd [#allocation8], 4294955008 }
  0x66   :  { %2153 = dma.done.wait [#allocation11], 14336  }
  0x67   :  { %2154 = vsyncadd [#allocation11], 4294952960  ;;  %v2172_v2 = vmov 0.0   ;;  %v133_v3 = vld [vmem:[#allocation4 + $0x8] sm:$0xff]  ;;  %v135_v4 = vld [vmem:[#allocation4 + $0x18] sm:$0xff]  ;;  %s2570_s22 = sld [smem:[#allocation22_spill]] }
  0x68   :  { %240 = vmatprep.mubr.f32.mxu0 %v2172_v2  ;;  %v132_v5 = vld [vmem:[#allocation4] sm:$0xff]  ;;  %v1589_v6 = vpack.c.bf16 %v135_v4, %v133_v3  ;;  %v134_v7 = vld [vmem:[#allocation4 + $0x10] sm:$0xff]  ;;  %v137_v8 = vld [vmem:[#allocation4 + $0x28] sm:$0xff]  ;;  %s2571_s1 = sld [smem:[#allocation24_spill]]  ;;  %vm1324_vm0 = vcmask 523264   ;;  %s2175_s2 = smov [#allocation13]  }
  0x69   :  { %v139_v9 = vld [vmem:[#allocation4 + $0x38] sm:$0xff]  ;;  %v1591_v10 = vpack.c.bf16 %v134_v7, %v132_v5  ;;  %v136_v12 = vld [vmem:[#allocation4 + $0x20] sm:$0xff]  ;;  %v138_v13 = vld [vmem:[#allocation4 + $0x30] sm:$0xff]  ;;  %s1387_s15 = sshll.u32 %s2175_s2, 4  ;;  %s2488_s15 = int_to_ptr.vmem [resolvable:$true] %s1387_s15 }
  0x6a   :  { %v1593_v11 = vpack.c.bf16 %v139_v9, %v137_v8  ;;  %v141_v14 = vld [vmem:[#allocation4 + $0x48] sm:$0xff]  ;;  %1590 = vmatprep.subr.bf16.mxu0 %v1589_v6  ;;  %v143_v15 = vld [vmem:[#allocation4 + $0x58] sm:$0xff]  ;;  %v1595_v16 = vpack.c.bf16 %v138_v13, %v136_v12  ;;  %v140_v18 = vld [vmem:[#allocation4 + $0x40] sm:$0xff] }
  0x6b   :  { %1592 = vmatpush1.bf16.msra.mxu0 %v1591_v10  ;;  %v1597_v17 = vpack.c.bf16 %v143_v15, %v141_v14  ;;  %v142_v19 = vld [vmem:[#allocation4 + $0x50] sm:$0xff]  ;;  %v145_v20 = vld [vmem:[#allocation4 + $0x68] sm:$0xff]  ;;  %v147_v21 = vld [vmem:[#allocation4 + $0x78] sm:$0xff] }
  0x6c   :  { %1594 = vmatprep.subr.bf16.mxu0 %v1593_v11  ;;  %v1599_v22 = vpack.c.bf16 %v142_v19, %v140_v18  ;;  %v1601_v23 = vpack.c.bf16 %v147_v21, %v145_v20  ;;  %v144_v24 = vld [vmem:[#allocation4 + $0x60] sm:$0xff]  ;;  %v146_v25 = vld [vmem:[#allocation4 + $0x70] sm:$0xff]  ;;  %v149_v26 = vld [vmem:[#allocation4 + $0x88] sm:$0xff] }
  0x6d   :  { %v151_v27 = vld [vmem:[#allocation4 + $0x98] sm:$0xff]  ;;  %v148_v28 = vld [vmem:[#allocation4 + $0x80] sm:$0xff]  ;;  %v150_v29 = vld [vmem:[#allocation4 + $0x90] sm:$0xff]  ;;  %v1603_v32 = vpack.c.bf16 %v146_v25, %v144_v24 }
  0x6e   :  { %v289_v30 = vld [vmem:[#allocation7 + $0x80] sm:$0xff]  ;;  %v290_v31 = vld [vmem:[#allocation7 + $0x88] sm:$0xff]  ;;  %v291_v37 = vld [vmem:[#allocation7 + $0x90] sm:$0xff]  ;;  %v1605_v38 = vpack.c.bf16 %v151_v27, %v149_v26  ;;  %v1607_v48 = vpack.c.bf16 %v150_v29, %v148_v28 }
  0x6f   :  { %1596 = vmatpush1.bf16.msra.mxu0 %v1595_v16  ;;  %v153_v33 = vld [vmem:[#allocation4 + $0xa8] sm:$0xff]  ;;  %v1621_v34 = vpack.c.bf16 %v290_v31, %v289_v30  ;;  %v273_v35 = vld [vmem:[#allocation7] sm:$0xff]  ;;  %v292_v40 = vld [vmem:[#allocation7 + $0x98] sm:$0xff] }
  0x70   :  { %1598 = vmatprep.subr.bf16.mxu0 %v1597_v17  ;;  %v274_v36 = vld [vmem:[#allocation7 + $0x8] sm:$0xff]  ;;  %v275_v41 = vld [vmem:[#allocation7 + $0x10] sm:$0xff]  ;;  %v276_v42 = vld [vmem:[#allocation7 + $0x18] sm:$0xff]  ;;  %v1625_v44 = vpack.c.bf16 %v292_v40, %v291_v37 }
  0x71   :  { %v1623_v39 = vpack.c.bf16 %v274_v36, %v273_v35  ;;  %v155_v43 = vld [vmem:[#allocation4 + $0xb8] sm:$0xff]  ;;  %1622 = vmatprep.subr.bf16.mxu1 %v1621_v34  ;;  %v293_v45 = vld [vmem:[#allocation7 + $0xa0] sm:$0xff]  ;;  %v294_v46 = vld [vmem:[#allocation7 + $0xa8] sm:$0xff]  ;;  %v1627_v47 = vpack.c.bf16 %v276_v42, %v275_v41 }
  0x72   :  { %v1629_v49 = vpack.c.bf16 %v294_v46, %v293_v45  ;;  %v277_v50 = vld [vmem:[#allocation7 + $0x20] sm:$0xff]  ;;  %v278_v51 = vld [vmem:[#allocation7 + $0x28] sm:$0xff]  ;;  %v1609_v52 = vpack.c.bf16 %v155_v43, %v153_v33  ;;  %v154_v54 = vld [vmem:[#allocation4 + $0xb0] sm:$0xff] }
  0x73   :  { %1600 = vmatpush1.bf16.msra.mxu0 %v1599_v22  ;;  %1624 = vmatpush3.bf16.msra.mxu1 %v1623_v39  ;;  %v152_v53 = vld [vmem:[#allocation4 + $0xa0] sm:$0xff]  ;;  %v157_v55 = vld [vmem:[#allocation4 + $0xc8] sm:$0xff]  ;;  %v159_v56 = vld [vmem:[#allocation4 + $0xd8] sm:$0xff]  ;;  %v1631_v57 = vpack.c.bf16 %v278_v51, %v277_v50 }
  0x74   :  { %1602 = vmatprep.subr.bf16.mxu0 %v1601_v23  ;;  %1626 = vmatprep.subr.bf16.mxu1 %v1625_v44  ;;  %v1611_v58 = vpack.c.bf16 %v154_v54, %v152_v53  ;;  %v1613_v59 = vpack.c.bf16 %v159_v56, %v157_v55  ;;  %v156_v60 = vld [vmem:[#allocation4 + $0xc0] sm:$0xff]  ;;  %v158_v61 = vld [vmem:[#allocation4 + $0xd0] sm:$0xff]  ;;  %v161_v62 = vld [vmem:[#allocation4 + $0xe8] sm:$0xff] }
  0x75   :  { %v163_v63 = vld [vmem:[#allocation4 + $0xf8] sm:$0xff]  ;;  %v1615_v0 = vpack.c.bf16 %v158_v61, %v156_v60  ;;  %v160_v3 = vld [vmem:[#allocation4 + $0xe0] sm:$0xff]  ;;  %v162_v4 = vld [vmem:[#allocation4 + $0xf0] sm:$0xff] }
  0x76   :  { %v1617_v1 = vpack.c.bf16 %v163_v63, %v161_v62  ;;  %v1619_v5 = vpack.c.bf16 %v162_v4, %v160_v3  ;;  %v2351_v6 = vld [vmem:[%s2570_s22] sm:$0xff]  ;;  %v2358_v7 = vld [vmem:[%s2570_s22 + $0x8] sm:$0xff]  ;;  %v295_v8 = vld [vmem:[#allocation7 + $0xb0] sm:$0xff] }
  0x77   :  { %1604 = vmatpush1.bf16.msra.mxu0 %v1603_v32  ;;  %1628 = vmatpush3.bf16.msra.mxu1 %v1627_v47  ;;  %v296_v9 = vld [vmem:[#allocation7 + $0xb8] sm:$0xff]  ;;  %v279_v11 = vld [vmem:[#allocation7 + $0x30] sm:$0xff]  ;;  %v297_v14 = vld [vmem:[#allocation7 + $0xc0] sm:$0xff] }
  0x78   :  { %1606 = vmatprep.subr.bf16.mxu0 %v1605_v38  ;;  %1630 = vmatprep.subr.bf16.mxu1 %v1629_v49  ;;  %v1633_v10 = vpack.c.bf16 %v296_v9, %v295_v8  ;;  %v280_v12 = vld [vmem:[#allocation7 + $0x38] sm:$0xff]  ;;  %v298_v15 = vld [vmem:[#allocation7 + $0xc8] sm:$0xff]  ;;  %v281_v17 = vld [vmem:[#allocation7 + $0x40] sm:$0xff] }
  0x79   :  { %v1635_v13 = vpack.c.bf16 %v280_v12, %v279_v11  ;;  %v1637_v16 = vpack.c.bf16 %v298_v15, %v297_v14  ;;  %v282_v18 = vld [vmem:[#allocation7 + $0x48] sm:$0xff]  ;;  %v299_v20 = vld [vmem:[#allocation7 + $0xd0] sm:$0xff]  ;;  %v300_v21 = vld [vmem:[#allocation7 + $0xd8] sm:$0xff] }
  0x7a   :  { %v1639_v19 = vpack.c.bf16 %v282_v18, %v281_v17  ;;  %v1641_v22 = vpack.c.bf16 %v300_v21, %v299_v20  ;;  %v283_v23 = vld [vmem:[#allocation7 + $0x50] sm:$0xff]  ;;  %v284_v24 = vld [vmem:[#allocation7 + $0x58] sm:$0xff]  ;;  %v301_v26 = vld [vmem:[#allocation7 + $0xe0] sm:$0xff] }
  0x7b   :  { %1608 = vmatpush1.bf16.msra.mxu0 %v1607_v48  ;;  %1632 = vmatpush3.bf16.msra.mxu1 %v1631_v57  ;;  %v1643_v25 = vpack.c.bf16 %v284_v24, %v283_v23  ;;  %v302_v27 = vld [vmem:[#allocation7 + $0xe8] sm:$0xff]  ;;  %v285_v29 = vld [vmem:[#allocation7 + $0x60] sm:$0xff]  ;;  %v303_v32 = vld [vmem:[#allocation7 + $0xf0] sm:$0xff] }
  0x7c   :  { %1610 = vmatprep.subr.bf16.mxu0 %v1609_v52  ;;  %1634 = vmatprep.subr.bf16.mxu1 %v1633_v10  ;;  %v1645_v28 = vpack.c.bf16 %v302_v27, %v301_v26  ;;  %v286_v30 = vld [vmem:[#allocation7 + $0x68] sm:$0xff]  ;;  %v304_v33 = vld [vmem:[#allocation7 + $0xf8] sm:$0xff]  ;;  %v287_v35 = vld [vmem:[#allocation7 + $0x70] sm:$0xff] }
  0x7d   :  { %v1647_v31 = vpack.c.bf16 %v286_v30, %v285_v29  ;;  %v1649_v34 = vpack.c.bf16 %v304_v33, %v303_v32  ;;  %v288_v36 = vld [vmem:[#allocation7 + $0x78] sm:$0xff]  ;;  %v454_v38 = vld [vmem:[#allocation10 + $0x8] sm:$0xff]  ;;  %v453_v43 = vld [vmem:[#allocation10] sm:$0xff] }
  0x7e   :  { %v1651_v37 = vpack.c.bf16 %v288_v36, %v287_v35  ;;  %v458_v39 = vld [vmem:[#allocation10 + $0x28] sm:$0xff]  ;;  %v456_v40 = vld [vmem:[#allocation10 + $0x18] sm:$0xff]  ;;  %v457_v44 = vld [vmem:[#allocation10 + $0x20] sm:$0xff] }
  0x7f   :  { %1612 = vmatpush1.bf16.msra.mxu0 %v1611_v58  ;;  %1636 = vmatpush3.bf16.msra.mxu1 %v1635_v13  ;;  %v1653_v41 = vpack.c.bf16 %v458_v39, %v454_v38  ;;  %v460_v42 = vld [vmem:[#allocation10 + $0x38] sm:$0xff]  ;;  %v1655_v46 = vpack.c.bf16 %v457_v44, %v453_v43  ;;  %v462_v47 = vld [vmem:[#allocation10 + $0x48] sm:$0xff]  ;;  %v461_v50 = vld [vmem:[#allocation10 + $0x40] sm:$0xff] }
  0x80   :  { %1614 = vmatprep.subr.bf16.mxu0 %v1613_v59  ;;  %1638 = vmatprep.subr.bf16.mxu1 %v1637_v16  ;;  %v1685_v45 = vpack.c.bf16 %v460_v42, %v456_v40  ;;  %v466_v48 = vld [vmem:[#allocation10 + $0x68] sm:$0xff]  ;;  %v465_v51 = vld [vmem:[#allocation10 + $0x60] sm:$0xff]  ;;  %v455_v44 = vld [vmem:[#allocation10 + $0x10] sm:$0xff] }
  0x81   :  { %v1657_v49 = vpack.c.bf16 %v466_v48, %v462_v47  ;;  %v1659_v52 = vpack.c.bf16 %v465_v51, %v461_v50  ;;  %v470_v53 = vld [vmem:[#allocation10 + $0x88] sm:$0xff]  ;;  %v469_v56 = vld [vmem:[#allocation10 + $0x80] sm:$0xff]  ;;  %v464_v48 = vld [vmem:[#allocation10 + $0x58] sm:$0xff] }
  0x82   :  { %v474_v54 = vld [vmem:[#allocation10 + $0xa8] sm:$0xff]  ;;  %v473_v57 = vld [vmem:[#allocation10 + $0xa0] sm:$0xff] }
  0x83   :  { %1616 = vmatpush1.bf16.msra.mxu0 %v1615_v0  ;;  %1640 = vmatpush3.bf16.msra.mxu1 %v1639_v19  ;;  %v1661_v55 = vpack.c.bf16 %v474_v54, %v470_v53  ;;  %v1663_v58 = vpack.c.bf16 %v473_v57, %v469_v56  ;;  %v478_v59 = vld [vmem:[#allocation10 + $0xc8] sm:$0xff]  ;;  %v477_v62 = vld [vmem:[#allocation10 + $0xc0] sm:$0xff] }
  0x84   :  { %1618 = vmatprep.subr.bf16.mxu0 %v1617_v1  ;;  %1642 = vmatprep.subr.bf16.mxu1 %v1641_v22  ;;  %v482_v60 = vld [vmem:[#allocation10 + $0xe8] sm:$0xff]  ;;  %v481_v63 = vld [vmem:[#allocation10 + $0xe0] sm:$0xff]  ;;  %v166_v22 = vlaneseq }
  0x85   :  { %v1665_v61 = vpack.c.bf16 %v482_v60, %v478_v59  ;;  %v486_v0 = vld [vmem:[#allocation10 + $0x108] sm:$0xff]  ;;  %v1667_v3 = vpack.c.bf16 %v481_v63, %v477_v62  ;;  %v489_v8 = vld [vmem:[#allocation10 + $0x120] sm:$0xff]  ;;  %v463_v60 = vld [vmem:[#allocation10 + $0x50] sm:$0xff] }
  0x86   :  { %v490_v1 = vld [vmem:[#allocation10 + $0x128] sm:$0xff]  ;;  %v493_v13 = vld [vmem:[#allocation10 + $0x140] sm:$0xff]  ;;  %v2363_v23 = vshrl.u32 %v166_v22, 7  ;;  %v472_v63 = vld [vmem:[#allocation10 + $0x98] sm:$0xff] }
  0x87   :  { %1620 = vmatpush1.bf16.msra.mxu0 %v1619_v5  ;;  %1644 = vmatpush3.bf16.msra.mxu1 %v1643_v25  ;;  %v1669_v4 = vpack.c.bf16 %v490_v1, %v486_v0  ;;  %v485_v5 = vld [vmem:[#allocation10 + $0x100] sm:$0xff]  ;;  %v494_v9 = vld [vmem:[#allocation10 + $0x148] sm:$0xff]  ;;  %v164_v25 = vld [vmem:[%s2571_s1] sm:$0x3] }
  0x88   :  { %1646 = vmatprep.subr.bf16.mxu1 %v1645_v28  ;;  %1654 = vmatprep.subr.bf16.mxu0 %v1653_v41  ;;  %v498_v10 = vld [vmem:[#allocation10 + $0x168] sm:$0xff]  ;;  %v1671_v11 = vpack.c.bf16 %v489_v8, %v485_v5  ;;  %v497_v14 = vld [vmem:[#allocation10 + $0x160] sm:$0xff]  ;;  %v2366_v24 = vsub.s32 0, %v2363_v23  ;;  %v2372_v26 = vsub.s32 1, %v2363_v23  ;;  %v476_v0 = vld [vmem:[#allocation10 + $0xb8] sm:$0xff] }
  0x89   :  { %v1673_v12 = vpack.c.bf16 %v498_v10, %v494_v9  ;;  %v502_v15 = vld [vmem:[#allocation10 + $0x188] sm:$0xff]  ;;  %v1675_v17 = vpack.c.bf16 %v497_v14, %v493_v13  ;;  %v501_v19 = vld [vmem:[#allocation10 + $0x180] sm:$0xff]  ;;  %v1693_v5 = vpack.c.bf16 %v476_v0, %v472_v63  ;;  %v471_v8 = vld [vmem:[#allocation10 + $0x90] sm:$0xff] }
  0x8a   :  { %241 = vmatmul.mubr.f32.vlgmr.msra.gmra.mrb[0].mxu0 %v2351_v6  ;;  %v506_v16 = vld [vmem:[#allocation10 + $0x1a8] sm:$0xff]  ;;  %v505_v20 = vld [vmem:[#allocation10 + $0x1a0] sm:$0xff]  ;;  %v169_v27 = vrot.slane %v164_v25, %v2366_v24  ;;  %v173_v28 = vrot.slane %v164_v25, %v2372_v26  ;;  %v475_v9 = vld [vmem:[#allocation10 + $0xb0] sm:$0xff] }
  0x8b   :  { %246 = vmatprep.mubr.f32.mxu0 %v2172_v2  ;;  %1648 = vmatpush3.bf16.msra.mxu1 %v1647_v31  ;;  %v1677_v18 = vpack.c.bf16 %v506_v16, %v502_v15  ;;  %v1679_v21 = vpack.c.bf16 %v505_v20, %v501_v19  ;;  %v480_v10 = vld [vmem:[#allocation10 + $0xd8] sm:$0xff]  ;;  %v479_v14 = vld [vmem:[#allocation10 + $0xd0] sm:$0xff]  ;;  %v398_v63 = vld [vmem:[#allocation9 + $0x48] sm:$0xff] }
  0x8c   :  { %1650 = vmatprep.subr.bf16.mxu1 %v1649_v34  ;;  %1656 = vmatpush1.bf16.msra.mxu0 %v1655_v46  ;;  %v483_v15 = vld [vmem:[#allocation10 + $0xf0] sm:$0xff]  ;;  %v488_v16 = vld [vmem:[#allocation10 + $0x118] sm:$0xff] }
  0x8d   :  { %1658 = vmatprep.subr.bf16.mxu0 %v1657_v49  ;;  %v468_v49 = vld [vmem:[#allocation10 + $0x78] sm:$0xff]  ;;  %v487_v20 = vld [vmem:[#allocation10 + $0x110] sm:$0xff] }
  0x8e   :  { %247 = vmatmul.mubr.f32.gmra.mrb[2].mxu0 %v2358_v7  ;;  %v1689_v59 = vpack.c.bf16 %v468_v49, %v464_v48  ;;  %v496_v25 = vld [vmem:[#allocation10 + $0x158] sm:$0xff]  ;;  %v511_v48 = vld [vmem:[#allocation10 + $0x1d0] sm:$0xff] }
  0x8f   :  { %581 = vmatprep.mubr.f32.mxu0 %v2172_v2  ;;  %1652 = vmatpush3.bf16.msra.mxu1 %v1651_v37  ;;  %v515_v49 = vld [vmem:[#allocation10 + $0x1f0] sm:$0xff] }
  0x90   :  { %1686 = vmatprep.subr.bf16.mxu1 %v1685_v45  ;;  %1660 = vmatpush1.bf16.msra.mxu0 %v1659_v52  ;;  %v459_v45 = vld [vmem:[#allocation10 + $0x30] sm:$0xff] }
  0x91   :  { %1662 = vmatprep.subr.bf16.mxu0 %v1661_v55  ;;  %v1687_v55 = vpack.c.bf16 %v459_v45, %v455_v44  ;;  %v509_v44 = vld [vmem:[#allocation10 + $0x1c0] sm:$0xff] }
  0x92   :  { %v513_v45 = vld [vmem:[#allocation10 + $0x1e0] sm:$0xff] }
  0x94   :  { %1664 = vmatpush1.bf16.msra.mxu0 %v1663_v58 }
  0x95   :  { %1666 = vmatprep.subr.bf16.mxu0 %v1665_v61  ;;  %v467_v61 = vld [vmem:[#allocation10 + $0x70] sm:$0xff] }
  0x98   :  { %1668 = vmatpush1.bf16.msra.mxu0 %v1667_v3 }
  0x99   :  { %1670 = vmatprep.subr.bf16.mxu0 %v1669_v4  ;;  %v1691_v4 = vpack.c.bf16 %v467_v61, %v463_v60  ;;  %v391_v61 = vld [vmem:[#allocation9 + $0x10] sm:$0xff] }
  0x9c   :  { %1672 = vmatpush1.bf16.msra.mxu0 %v1671_v11  ;;  %v484_v11 = vld [vmem:[#allocation10 + $0xf8] sm:$0xff] }
  0x9d   :  { %1674 = vmatprep.subr.bf16.mxu0 %v1673_v12  ;;  %v1695_v12 = vpack.c.bf16 %v475_v9, %v471_v8  ;;  %v1697_v13 = vpack.c.bf16 %v484_v11, %v480_v10  ;;  %v397_v10 = vld [vmem:[#allocation9 + $0x40] sm:$0xff] }
  0x9e   :  { %v401_v11 = vld [vmem:[#allocation9 + $0x60] sm:$0xff] }
  0xa0   :  { %1676 = vmatpush1.bf16.msra.mxu0 %v1675_v17  ;;  %v492_v17 = vld [vmem:[#allocation10 + $0x138] sm:$0xff] }
  0xa1   :  { %1678 = vmatprep.subr.bf16.mxu0 %v1677_v18  ;;  %v1699_v18 = vpack.c.bf16 %v483_v15, %v479_v14  ;;  %v1701_v19 = vpack.c.bf16 %v492_v17, %v488_v16  ;;  %v399_v15 = vld [vmem:[#allocation9 + $0x50] sm:$0xff] }
  0xa2   :  { %v403_v16 = vld [vmem:[#allocation9 + $0x70] sm:$0xff] }
  0xa4   :  { %1680 = vmatpush1.bf16.msra.mxu0 %v1679_v21  ;;  %v491_v21 = vld [vmem:[#allocation10 + $0x130] sm:$0xff] }
 0x15d   :  { %v242_v29 = vpop.f32.mrb[0].mxu0 }
 0x15e   :  { %v243_v30 = vadd.f32 %v242_v29, %v169_v27  ;;  %v244_v31 = vpop.f32.mrb[1].mxu0 }
 0x15f   :  { %v245_v32 = vadd.f32 %v244_v31, %v173_v28  ;;  %v499_v31 = vld [vmem:[#allocation10 + $0x170] sm:$0xff] }
 0x160   :  { %v257_v33 = vmul.f32 0.70710677, %v243_v30  ;;  %v253_v50 = vmul.f32 0.5, %v243_v30  ;;  %v495_v30 = vld [vmem:[#allocation10 + $0x150] sm:$0xff] }
 0x161   :  { %v258_v34 = vmul.f32 0.70710677, %v245_v32  ;;  %v248_v35 = vpop.f32.mrb[2].mxu0  ;;  %v254_v46 = vmul.f32 0.5, %v245_v32  ;;  %v504_v32 = vld [vmem:[#allocation10 + $0x198] sm:$0xff] }
 0x162   :  { %1905 = verf.f32 %v257_v33  ;;  %v249_v36 = vadd.f32 %v248_v35, %v169_v27  ;;  %v250_v37 = vpop.f32.mrb[3].mxu0  ;;  %v500_v27 = vld [vmem:[#allocation10 + $0x178] sm:$0xff] }
 0x163   :  { %1907 = verf.f32 %v258_v34  ;;  %v251_v38 = vadd.f32 %v250_v37, %v173_v28  ;;  %v1703_v28 = vpack.c.bf16 %v491_v21, %v487_v20  ;;  %v1705_v29 = vpack.c.bf16 %v500_v27, %v496_v25  ;;  %v508_v33 = vld [vmem:[#allocation10 + $0x1b8] sm:$0xff]  ;;  %v507_v37 = vld [vmem:[#allocation10 + $0x1b0] sm:$0xff]  ;;  %v410_v20 = vld [vmem:[#allocation9 + $0xa8] sm:$0xff] }
 0x164   :  { %v259_v39 = vmul.f32 0.70710677, %v249_v36  ;;  %v255_v51 = vmul.f32 0.5, %v249_v36  ;;  %v1707_v34 = vpack.c.bf16 %v499_v31, %v495_v30  ;;  %v1709_v35 = vpack.c.bf16 %v508_v33, %v504_v32  ;;  %v503_v36 = vld [vmem:[#allocation10 + $0x190] sm:$0xff]  ;;  %v408_v21 = vld [vmem:[#allocation9 + $0x98] sm:$0xff]  ;;  %v405_v30 = vld [vmem:[#allocation9 + $0x80] sm:$0xff] }
 0x165   :  { %v260_v40 = vmul.f32 0.70710677, %v251_v38  ;;  %v256_v53 = vmul.f32 0.5, %v251_v38  ;;  %v1711_v38 = vpack.c.bf16 %v507_v37, %v503_v36  ;;  %v412_v25 = vld [vmem:[#allocation9 + $0xb8] sm:$0xff]  ;;  %v409_v31 = vld [vmem:[#allocation9 + $0xa0] sm:$0xff]  ;;  %v411_v36 = vld [vmem:[#allocation9 + $0xb0] sm:$0xff] }
 0x166   :  { %1909 = verf.f32 %v259_v39  ;;  %v510_v39 = vld [vmem:[#allocation10 + $0x1c8] sm:$0xff] }
 0x167   :  { %1911 = verf.f32 %v260_v40  ;;  %v514_v40 = vld [vmem:[#allocation10 + $0x1e8] sm:$0xff] }
 0x168   :  { %v414_v37 = vld [vmem:[#allocation9 + $0xc8] sm:$0xff] }
 0x16c   :  { %v1906_v41 = vpop.eup %1905 }
 0x16d   :  { %v1908_v42 = vpop.eup %1907  ;;  %v265_v43 = vadd.f32 1.0, %v1906_v41  ;;  %v512_v41 = vld [vmem:[#allocation10 + $0x1d8] sm:$0xff] }
 0x16e   :  { %v266_v47 = vadd.f32 1.0, %v1908_v42  ;;  %v1681_v42 = vpack.c.bf16 %v514_v40, %v510_v39  ;;  %v416_v39 = vld [vmem:[#allocation9 + $0xd8] sm:$0xff] }
 0x16f   :  { %v269_v58 = vmul.f32 %v265_v43, %v253_v50  ;;  %v516_v43 = vld [vmem:[#allocation10 + $0x1f8] sm:$0xff]  ;;  %v1715_v50 = vpack.c.bf16 %v515_v49, %v511_v48  ;;  %v419_v48 = vld [vmem:[#allocation9 + $0xf0] sm:$0xff]  ;;  %v422_v49 = vld [vmem:[#allocation9 + $0x108] sm:$0xff] }
 0x170   :  { %v1910_v52 = vpop.eup %1909  ;;  %v270_v54 = vmul.f32 %v266_v47, %v254_v46  ;;  %v1713_v46 = vpack.c.bf16 %v516_v43, %v512_v41  ;;  %v1683_v47 = vpack.c.bf16 %v513_v45, %v509_v44  ;;  %1682 = vmatprep.subr.bf16.mxu0 %v1681_v42  ;;  %v420_v40 = vld [vmem:[#allocation9 + $0xf8] sm:$0xff]  ;;  %v1727_v41 = vpack.c.bf16 %v409_v31, %v405_v30  ;;  %v413_v43 = vld [vmem:[#allocation9 + $0xc0] sm:$0xff]  ;;  %v450_v30 = vld [vmem:[#allocation9 + $0x1e8] sm:$0xff] }
 0x171   :  { %v1912_v56 = vpop.eup %1911  ;;  %v267_v57 = vadd.f32 1.0, %v1910_v52  ;;  %v394_v52 = vld [vmem:[#allocation9 + $0x28] sm:$0xff]  ;;  %v417_v44 = vld [vmem:[#allocation9 + $0xe0] sm:$0xff]  ;;  %v448_v31 = vld [vmem:[#allocation9 + $0x1d8] sm:$0xff] }
 0x172   :  { %v268_v62 = vadd.f32 1.0, %v1912_v56  ;;  %376 = vmatprep.mubr.f32.mxu1 %v270_v54  ;;  %1684 = vmatpush1.bf16.msra.mxu0 %v1683_v47  ;;  %v415_v47 = vld [vmem:[#allocation9 + $0xd0] sm:$0xff] }
 0x173   :  { %377 = vmatmul.mubr.f32.vlgmr.msra.gmra.mrb[0].mxu1 %v269_v58  ;;  %v271_v1 = vmul.f32 %v267_v57, %v255_v51  ;;  %v390_v51 = vld [vmem:[#allocation9 + $0x8] sm:$0xff]  ;;  %v1432_v57 = vld [vmem:[%s2545_s4] ss:$0 sm:$0xff]  ;;  %v389_v58 = vld [vmem:[#allocation9] sm:$0xff] }
 0x174   :  { %v272_v3 = vmul.f32 %v268_v62, %v256_v53  ;;  %1688 = vmatpush1.bf16.msra.mxu1 %v1687_v55  ;;  %v392_v53 = vld [vmem:[#allocation9 + $0x18] sm:$0xff]  ;;  %v1717_v54 = vpack.c.bf16 %v394_v52, %v390_v51  ;;  %v395_v62 = vld [vmem:[#allocation9 + $0x30] sm:$0xff] }
 0x175   :  { %1690 = vmatprep.subr.bf16.mxu1 %v1689_v59  ;;  %v396_v55 = vld [vmem:[#allocation9 + $0x38] sm:$0xff]  ;;  %v393_v59 = vld [vmem:[#allocation9 + $0x20] sm:$0xff]  ;;  %v1751_v9 = vpack.c.bf16 %v395_v62, %v391_v61  ;;  %v430_v61 = vld [vmem:[#allocation9 + $0x148] sm:$0xff] }
 0x176   :  { %381 = vmatprep.mubr.f32.mxu1 %v272_v3  ;;  %v1749_v56 = vpack.c.bf16 %v396_v55, %v392_v53  ;;  %1718 = vmatprep.subr.bf16.mxu0 %v1717_v54  ;;  %v400_v3 = vld [vmem:[#allocation9 + $0x58] sm:$0xff]  ;;  %v1719_v8 = vpack.c.bf16 %v393_v59, %v389_v58  ;;  %v1731_v53 = vpack.c.bf16 %v417_v44, %v413_v43  ;;  %v421_v55 = vld [vmem:[#allocation9 + $0x100] sm:$0xff]  ;;  %v423_v59 = vld [vmem:[#allocation9 + $0x110] sm:$0xff] }
 0x177   :  { %382 = vmatmul.mubr.f32.gmra.mrb[2].mxu1 %v271_v1  ;;  %v402_v1 = vld [vmem:[#allocation9 + $0x68] sm:$0xff]  ;;  %v424_v51 = vld [vmem:[#allocation9 + $0x118] sm:$0xff]  ;;  %v1763_v54 = vpack.c.bf16 %v419_v48, %v415_v47  ;;  %v960_v43 = vld [vmem:[#allocation12 + $0x20] sm:$0xff] }
 0x178   :  { %1692 = vmatpush1.bf16.msra.mxu1 %v1691_v4  ;;  %658 = vmatprep.mubr.f32.mxu1 %v2172_v2  ;;  %v404_v4 = vld [vmem:[#allocation9 + $0x78] sm:$0xff]  ;;  %v434_v62 = vld [vmem:[#allocation9 + $0x168] sm:$0xff]  ;;  %v958_v44 = vld [vmem:[#allocation12 + $0x10] sm:$0xff] }
 0x179   :  { %1694 = vmatprep.subr.bf16.mxu1 %v1693_v5  ;;  %v1753_v14 = vpack.c.bf16 %v404_v4, %v400_v3  ;;  %v428_v52 = vld [vmem:[#allocation9 + $0x138] sm:$0xff]  ;;  %v429_v4 = vld [vmem:[#allocation9 + $0x140] sm:$0xff] }
 0x17a   :  { %v1765_v58 = vpack.c.bf16 %v428_v52, %v424_v51  ;;  %v959_v51 = vld [vmem:[#allocation12 + $0x18] sm:$0xff] }
 0x17b   :  { %v963_v52 = vld [vmem:[#allocation12 + $0x38] sm:$0xff] }
 0x17c   :  { %1696 = vmatpush1.bf16.msra.mxu1 %v1695_v12 }
 0x17d   :  { %1698 = vmatprep.subr.bf16.mxu1 %v1697_v13  ;;  %v1721_v13 = vpack.c.bf16 %v402_v1, %v398_v63  ;;  %v432_v63 = vld [vmem:[#allocation9 + $0x158] sm:$0xff] }
 0x180   :  { %1700 = vmatpush1.bf16.msra.mxu1 %v1699_v18  ;;  %v406_v18 = vld [vmem:[#allocation9 + $0x88] sm:$0xff] }
 0x181   :  { %1702 = vmatprep.subr.bf16.mxu1 %v1701_v19  ;;  %v1725_v33 = vpack.c.bf16 %v410_v20, %v406_v18  ;;  %v441_v20 = vld [vmem:[#allocation9 + $0x1a0] sm:$0xff] }
 0x184   :  { %1704 = vmatpush1.bf16.msra.mxu1 %v1703_v28  ;;  %v1723_v28 = vpack.c.bf16 %v401_v11, %v397_v10  ;;  %v431_v10 = vld [vmem:[#allocation9 + $0x150] sm:$0xff] }
 0x185   :  { %1706 = vmatprep.subr.bf16.mxu1 %v1705_v29  ;;  %v1755_v29 = vpack.c.bf16 %v403_v16, %v399_v15  ;;  %v435_v11 = vld [vmem:[#allocation9 + $0x170] sm:$0xff]  ;;  %v440_v15 = vld [vmem:[#allocation9 + $0x198] sm:$0xff] }
 0x186   :  { %v444_v16 = vld [vmem:[#allocation9 + $0x1b8] sm:$0xff]  ;;  %v1771_v18 = vpack.c.bf16 %v435_v11, %v431_v10  ;;  %v978_v10 = vld [vmem:[#allocation12 + $0xb0] sm:$0xff]  ;;  %v976_v11 = vld [vmem:[#allocation12 + $0xa0] sm:$0xff] }
 0x188   :  { %1708 = vmatpush1.bf16.msra.mxu1 %v1707_v34  ;;  %v1757_v34 = vpack.c.bf16 %v412_v25, %v408_v21  ;;  %v1773_v25 = vpack.c.bf16 %v444_v16, %v440_v15  ;;  %v974_v16 = vld [vmem:[#allocation12 + $0x90] sm:$0xff] }
 0x189   :  { %1710 = vmatprep.subr.bf16.mxu1 %v1709_v35  ;;  %v407_v35 = vld [vmem:[#allocation9 + $0x90] sm:$0xff] }
 0x18a   :  { %v1759_v42 = vpack.c.bf16 %v411_v36, %v407_v35  ;;  %v445_v36 = vld [vmem:[#allocation9 + $0x1c0] sm:$0xff] }
 0x18c   :  { %1712 = vmatpush1.bf16.msra.mxu1 %v1711_v38  ;;  %v418_v38 = vld [vmem:[#allocation9 + $0xe8] sm:$0xff] }
 0x18d   :  { %1714 = vmatprep.subr.bf16.mxu1 %v1713_v46  ;;  %v1729_v45 = vpack.c.bf16 %v418_v38, %v414_v37  ;;  %v1761_v46 = vpack.c.bf16 %v420_v40, %v416_v39  ;;  %v449_v37 = vld [vmem:[#allocation9 + $0x1e0] sm:$0xff]  ;;  %v447_v40 = vld [vmem:[#allocation9 + $0x1d0] sm:$0xff] }
 0x190   :  { %1716 = vmatpush1.bf16.msra.mxu1 %v1715_v50  ;;  %v426_v50 = vld [vmem:[#allocation9 + $0x128] sm:$0xff] }
 0x191   :  { %1750 = vmatprep.subr.bf16.mxu1 %v1749_v56  ;;  %v425_v56 = vld [vmem:[#allocation9 + $0x120] sm:$0xff] }
 0x192   :  { %v1735_v1 = vpack.c.bf16 %v425_v56, %v421_v55  ;;  %v967_v55 = vld [vmem:[#allocation12 + $0x58] sm:$0xff] }
 0x246   :  { %v1477_v60 = vpop.f32.mrb[0].mxu1 }
 0x247   :  { %v1478_v0 = vpop.f32.mrb[1].mxu1 }
 0x248   :  { %v1479_v5 = vadd.f32 %v1478_v0, %v1477_v60  ;;  %v427_v60 = vld [vmem:[#allocation9 + $0x130] sm:$0xff]  ;;  %v436_v0 = vld [vmem:[#allocation9 + $0x178] sm:$0xff] }
 0x249   :  { %v1767_v3 = vpack.c.bf16 %v427_v60, %v423_v59 }
 0x24a   :  { %v2380_v12 = vadd.f32 %v1479_v5, %v1432_v57  ;;  %v1480_v17 = vpop.f32.mrb[2].mxu1  ;;  %v433_v5 = vld [vmem:[#allocation9 + $0x160] sm:$0xff] }
 0x24b   :  { %v1481_v19 = vpop.f32.mrb[3].mxu1 }
 0x24c   :  { %387 = vst [vmem:[#allocation13] sm:$0xff] %v2380_v12  ;;  %582 = vmatmul.mubr.f32.vlgmr.msra.gmra.mrb[4].mxu0 %v2380_v12  ;;  %659 = vmatmul.mubr.f32.vlgmr.msra.gmra.mrb[4].mxu1 %v2380_v12  ;;  %v1482_v27 = vadd.f32 %v1481_v19, %v1480_v17  ;;  %v1739_v17 = vpack.c.bf16 %v433_v5, %v429_v4  ;;  %v437_v19 = vld [vmem:[#allocation9 + $0x180] sm:$0xff]  ;;  %v971_v5 = vld [vmem:[#allocation12 + $0x78] sm:$0xff] }
 0x24d   :  { %1720 = vmatpush1.bf16.msra.mxu0 %v1719_v8  ;;  %1752 = vmatpush1.bf16.msra.mxu1 %v1751_v9  ;;  %v1737_v8 = vpack.c.bf16 %v434_v62, %v430_v61  ;;  %v1769_v9 = vpack.c.bf16 %v436_v0, %v432_v63  ;;  %v969_v61 = vld [vmem:[#allocation12 + $0x68] sm:$0xff]  ;;  %v972_v62 = vld [vmem:[#allocation12 + $0x80] sm:$0xff]  ;;  %v970_v63 = vld [vmem:[#allocation12 + $0x70] sm:$0xff] }
 0x24e   :  { %1722 = vmatprep.subr.bf16.mxu0 %v1721_v13  ;;  %1754 = vmatprep.subr.bf16.mxu1 %v1753_v14  ;;  %v2385_v32 = vadd.f32 %v1482_v27, %v1432_v57  ;;  %v1733_v57 = vpack.c.bf16 %v426_v50, %v422_v49  ;;  %v438_v13 = vld [vmem:[#allocation9 + $0x188] sm:$0xff]  ;;  %v439_v27 = vld [vmem:[#allocation9 + $0x190] sm:$0xff]  ;;  %v956_v50 = vld [vmem:[#allocation12] sm:$0xff] }
 0x24f   :  { %587 = vmatprep.mubr.f32.mxu0 %v2172_v2  ;;  %664 = vmatprep.mubr.f32.mxu1 %v2172_v2  ;;  %v442_v14 = vld [vmem:[#allocation9 + $0x1a8] sm:$0xff]  ;;  %v1783_v56 = vpack.c.bf16 %v959_v51, %v956_v50  ;;  %v968_v4 = vld [vmem:[#allocation12 + $0x60] sm:$0xff]  ;;  %v1002_v50 = vld [vmem:[#allocation12 + $0x170] sm:$0xff] }
 0x250   :  { %388 = vst [vmem:[#allocation13 + $0x8] sm:$0xff] %v2385_v32  ;;  %588 = vmatmul.mubr.f32.gmra.mrb[6].mxu0 %v2385_v32  ;;  %665 = vmatmul.mubr.f32.gmra.mrb[6].mxu1 %v2385_v32  ;;  %v1741_v21 = vpack.c.bf16 %v442_v14, %v438_v13  ;;  %v973_v0 = vld [vmem:[#allocation12 + $0x88] sm:$0xff]  ;;  %v979_v13 = vld [vmem:[#allocation12 + $0xb8] sm:$0xff]  ;;  %v1000_v51 = vld [vmem:[#allocation12 + $0x160] sm:$0xff] }
 0x251   :  { %1724 = vmatpush1.bf16.msra.mxu0 %v1723_v28  ;;  %1756 = vmatpush1.bf16.msra.mxu1 %v1755_v29  ;;  %v443_v28 = vld [vmem:[#allocation9 + $0x1b0] sm:$0xff]  ;;  %v446_v29 = vld [vmem:[#allocation9 + $0x1c8] sm:$0xff]  ;;  %v1825_v15 = vpack.c.bf16 %v979_v13, %v976_v11 }
 0x252   :  { %1726 = vmatprep.subr.bf16.mxu0 %v1725_v33  ;;  %1758 = vmatprep.subr.bf16.mxu1 %v1757_v34  ;;  %v452_v33 = vld [vmem:[#allocation9 + $0x1f8] sm:$0xff]  ;;  %v1743_v34 = vpack.c.bf16 %v441_v20, %v437_v19  ;;  %v1775_v35 = vpack.c.bf16 %v443_v28, %v439_v27  ;;  %v1745_v38 = vpack.c.bf16 %v450_v30, %v446_v29  ;;  %v984_v19 = vld [vmem:[#allocation12 + $0xe0] sm:$0xff]  ;;  %v982_v20 = vld [vmem:[#allocation12 + $0xd0] sm:$0xff] }
 0x253   :  { %735 = vmatprep.mubr.f32.mxu0 %v2172_v2  ;;  %812 = vmatprep.mubr.f32.mxu1 %v2172_v2  ;;  %v1777_v39 = vpack.c.bf16 %v452_v33, %v448_v31  ;;  %v980_v28 = vld [vmem:[#allocation12 + $0xc0] sm:$0xff]  ;;  %v983_v29 = vld [vmem:[#allocation12 + $0xd8] sm:$0xff]  ;;  %v990_v31 = vld [vmem:[#allocation12 + $0x110] sm:$0xff] }
 0x254   :  { %v987_v30 = vld [vmem:[#allocation12 + $0xf8] sm:$0xff]  ;;  %v988_v33 = vld [vmem:[#allocation12 + $0x100] sm:$0xff]  ;;  %v1217_v13 = vld [vmem:[%s2553_s12 + $0x50] sm:$0xff] }
 0x255   :  { %1728 = vmatpush1.bf16.msra.mxu0 %v1727_v41  ;;  %1760 = vmatpush1.bf16.msra.mxu1 %v1759_v42  ;;  %v451_v41 = vld [vmem:[#allocation9 + $0x1f0] sm:$0xff]  ;;  %v957_v42 = vld [vmem:[#allocation12 + $0x8] sm:$0xff] }
 0x256   :  { %1730 = vmatprep.subr.bf16.mxu0 %v1729_v45  ;;  %1762 = vmatprep.subr.bf16.mxu1 %v1761_v46  ;;  %v961_v45 = vld [vmem:[#allocation12 + $0x28] sm:$0xff]  ;;  %v1747_v46 = vpack.c.bf16 %v449_v37, %v445_v36  ;;  %v1779_v47 = vpack.c.bf16 %v451_v41, %v447_v40  ;;  %v1781_v48 = vpack.c.bf16 %v960_v43, %v957_v42  ;;  %v996_v41 = vld [vmem:[#allocation12 + $0x140] sm:$0xff]  ;;  %v994_v42 = vld [vmem:[#allocation12 + $0x130] sm:$0xff] }
 0x257   :  { %v1813_v49 = vpack.c.bf16 %v961_v45, %v958_v44  ;;  %v1801_v36 = vpack.c.bf16 %v990_v31, %v987_v30  ;;  %v993_v40 = vld [vmem:[#allocation12 + $0x128] sm:$0xff] }
 0x258   :  { %v997_v43 = vld [vmem:[#allocation12 + $0x148] sm:$0xff]  ;;  %v1805_v45 = vpack.c.bf16 %v996_v41, %v993_v40 }
 0x259   :  { %1732 = vmatpush1.bf16.msra.mxu0 %v1731_v53  ;;  %1764 = vmatpush1.bf16.msra.mxu1 %v1763_v54  ;;  %v966_v53 = vld [vmem:[#allocation12 + $0x50] sm:$0xff]  ;;  %v964_v54 = vld [vmem:[#allocation12 + $0x40] sm:$0xff] }
 0x25a   :  { %1734 = vmatprep.subr.bf16.mxu0 %v1733_v57  ;;  %1766 = vmatprep.subr.bf16.mxu1 %v1765_v58  ;;  %v962_v57 = vld [vmem:[#allocation12 + $0x30] sm:$0xff]  ;;  %v965_v58 = vld [vmem:[#allocation12 + $0x48] sm:$0xff]  ;;  %v1785_v59 = vpack.c.bf16 %v966_v53, %v963_v52  ;;  %v1817_v60 = vpack.c.bf16 %v967_v55, %v964_v54  ;;  %v1003_v52 = vld [vmem:[#allocation12 + $0x178] sm:$0xff] }
 0x25b   :  { %v1841_v55 = vpack.c.bf16 %v1003_v52, %v1000_v51 }
 0x25d   :  { %1736 = vmatpush1.bf16.msra.mxu0 %v1735_v1  ;;  %1768 = vmatpush1.bf16.msra.mxu1 %v1767_v3  ;;  %v1787_v1 = vpack.c.bf16 %v965_v58, %v962_v57  ;;  %v1789_v3 = vpack.c.bf16 %v972_v62, %v969_v61  ;;  %v1001_v57 = vld [vmem:[#allocation12 + $0x168] sm:$0xff]  ;;  %v1207_v58 = vld [vmem:[%s2553_s12] sm:$0xff] }
 0x25e   :  { %1738 = vmatprep.subr.bf16.mxu0 %v1737_v8  ;;  %1770 = vmatprep.subr.bf16.mxu1 %v1769_v9  ;;  %v975_v8 = vld [vmem:[#allocation12 + $0x98] sm:$0xff]  ;;  %v1821_v9 = vpack.c.bf16 %v973_v0, %v970_v63  ;;  %v1209_v62 = vld [vmem:[%s2553_s12 + $0x10] sm:$0xff] }
 0x25f   :  { %v1793_v14 = vpack.c.bf16 %v978_v10, %v975_v8  ;;  %v1210_v63 = vld [vmem:[%s2553_s12 + $0x18] sm:$0xff]  ;;  %v1216_v10 = vld [vmem:[%s2553_s12 + $0x48] sm:$0xff] }
 0x260   :  { %v1849_v0 = vpack.c.bf16 %v1210_v63, %v1209_v62  ;;  %v1214_v8 = vld [vmem:[%s2553_s12 + $0x38] sm:$0xff] }
 0x261   :  { %1740 = vmatpush1.bf16.msra.mxu0 %v1739_v17  ;;  %1772 = vmatpush1.bf16.msra.mxu1 %v1771_v18  ;;  %v977_v17 = vld [vmem:[#allocation12 + $0xa8] sm:$0xff] }
 0x262   :  { %1742 = vmatprep.subr.bf16.mxu0 %v1741_v21  ;;  %1774 = vmatprep.subr.bf16.mxu1 %v1773_v25  ;;  %v981_v18 = vld [vmem:[#allocation12 + $0xc8] sm:$0xff] }
 0x263   :  { %v985_v21 = vld [vmem:[#allocation12 + $0xe8] sm:$0xff]  ;;  %v1797_v25 = vpack.c.bf16 %v984_v19, %v981_v18  ;;  %v1222_v18 = vld [vmem:[%s2553_s12 + $0x78] sm:$0xff] }
 0x264   :  { %v1829_v27 = vpack.c.bf16 %v985_v21, %v982_v20  ;;  %v2457_v20 = vsub.s32 2, %v2363_v23  ;;  %v825_v21 = vld [vmem:[%s2548_s7] sm:$0xf] }
 0x265   :  { %1744 = vmatpush1.bf16.msra.mxu0 %v1743_v34  ;;  %1776 = vmatpush1.bf16.msra.mxu1 %v1775_v35  ;;  %v991_v34 = vld [vmem:[#allocation12 + $0x118] sm:$0xff]  ;;  %v1799_v35 = vpack.c.bf16 %v983_v29, %v980_v28  ;;  %v834_v28 = vrot.slane %v825_v21, %v2372_v26 }
 0x266   :  { %1746 = vmatprep.subr.bf16.mxu0 %v1745_v38  ;;  %1778 = vmatprep.subr.bf16.mxu1 %v1777_v39  ;;  %v1833_v37 = vpack.c.bf16 %v991_v34, %v988_v33  ;;  %v986_v38 = vld [vmem:[#allocation12 + $0xf0] sm:$0xff]  ;;  %v989_v39 = vld [vmem:[#allocation12 + $0x108] sm:$0xff] }
 0x267   :  { %v1803_v44 = vpack.c.bf16 %v989_v39, %v986_v38 }
 0x269   :  { %1748 = vmatpush1.bf16.msra.mxu0 %v1747_v46  ;;  %1780 = vmatpush1.bf16.msra.mxu1 %v1779_v47  ;;  %v1837_v46 = vpack.c.bf16 %v997_v43, %v994_v42  ;;  %v992_v47 = vld [vmem:[#allocation12 + $0x120] sm:$0xff] }
 0x26a   :  { %1782 = vmatprep.subr.bf16.mxu0 %v1781_v48  ;;  %1814 = vmatprep.subr.bf16.mxu1 %v1813_v49  ;;  %v995_v48 = vld [vmem:[#allocation12 + $0x138] sm:$0xff] }
 0x26b   :  { %v1807_v53 = vpack.c.bf16 %v995_v48, %v992_v47 }
 0x26c   :  { %736 = vmatmul.mubr.f32.vlgmr.msra.gmra.mrb[4].mxu0 %v2351_v6  ;;  %813 = vmatmul.mubr.f32.vlgmr.msra.gmra.mrb[4].mxu1 %v2351_v6  ;;  %v1791_v6 = vpack.c.bf16 %v971_v5, %v968_v4  ;;  %v1213_v5 = vld [vmem:[%s2553_s12 + $0x30] sm:$0xff] }
 0x26d   :  { %1784 = vmatpush1.bf16.msra.mxu0 %v1783_v56  ;;  %1816 = vmatpush3.bf16.msra.mxu1 %v1813_v49  ;;  %v999_v49 = vld [vmem:[#allocation12 + $0x158] sm:$0xff]  ;;  %v998_v56 = vld [vmem:[#allocation12 + $0x150] sm:$0xff] }
 0x26e   :  { %741 = vmatprep.mubr.f32.mxu0 %v2172_v2  ;;  %818 = vmatprep.mubr.f32.mxu1 %v2172_v2  ;;  %v1809_v54 = vpack.c.bf16 %v1002_v50, %v999_v49 }
 0x26f   :  { %1786 = vmatprep.subr.bf16.mxu0 %v1785_v59  ;;  %1818 = vmatprep.subr.bf16.mxu1 %v1817_v60  ;;  %v1208_v59 = vld [vmem:[%s2553_s12 + $0x8] sm:$0xff] }
 0x270   :  { %742 = vmatmul.mubr.f32.gmra.mrb[6].mxu0 %v2358_v7  ;;  %819 = vmatmul.mubr.f32.gmra.mrb[6].mxu1 %v2358_v7  ;;  %v1795_v7 = vpack.c.bf16 %v977_v17, %v974_v16  ;;  %v1845_v61 = vpack.c.bf16 %v1208_v59, %v1207_v58  ;;  %v1221_v17 = vld [vmem:[%s2553_s12 + $0x70] sm:$0xff] }
 0x271   :  { %1788 = vmatpush1.bf16.msra.mxu0 %v1787_v1  ;;  %1820 = vmatpush3.bf16.msra.mxu1 %v1817_v60  ;;  %v1811_v60 = vpack.c.bf16 %v1001_v57, %v998_v56  ;;  %v1211_v1 = vld [vmem:[%s2553_s12 + $0x20] sm:$0xff]  ;;  %v1873_v19 = vpack.c.bf16 %v1222_v18, %v1221_v17 }
 0x272   :  { %1551 = vmatprep.mubr.f32.mxu1 %v2380_v12  ;;  %1790 = vmatprep.subr.bf16.mxu0 %v1789_v3  ;;  %v1212_v3 = vld [vmem:[%s2553_s12 + $0x28] sm:$0xff] }
 0x273   :  { %1822 = vmatprep.subr.bf16.mxu1 %v1821_v9  ;;  %1085 = vmatprep.mubr.f32.mxu0 %v2172_v2  ;;  %v1853_v4 = vpack.c.bf16 %v1212_v3, %v1211_v1 }
 0x275   :  { %1792 = vmatpush1.bf16.msra.mxu0 %v1791_v6  ;;  %1824 = vmatpush3.bf16.msra.mxu1 %v1821_v9  ;;  %v1857_v9 = vpack.c.bf16 %v1214_v8, %v1213_v5 }
 0x276   :  { %1794 = vmatprep.subr.bf16.mxu0 %v1793_v14  ;;  %1826 = vmatprep.subr.bf16.mxu1 %v1825_v15  ;;  %v1219_v14 = vld [vmem:[%s2553_s12 + $0x60] sm:$0xff] }
 0x279   :  { %1796 = vmatpush1.bf16.msra.mxu0 %v1795_v7  ;;  %1828 = vmatpush3.bf16.msra.mxu1 %v1825_v15  ;;  %v1220_v15 = vld [vmem:[%s2553_s12 + $0x68] sm:$0xff]  ;;  %v841_v7 = vsub.s32 3, %v2363_v23  ;;  %v1004_v23 = vld [vmem:[%s2552_s11] sm:$0x7] }
 0x27a   :  { %1798 = vmatprep.subr.bf16.mxu0 %v1797_v25  ;;  %1830 = vmatprep.subr.bf16.mxu1 %v1829_v27  ;;  %v1869_v16 = vpack.c.bf16 %v1220_v15, %v1219_v14  ;;  %v830_v25 = vrot.slane %v825_v21, %v2366_v24 }
 0x27b   :  { %v842_v29 = vrot.slane %v825_v21, %v841_v7 }
 0x27d   :  { %1800 = vmatpush1.bf16.msra.mxu0 %v1799_v35  ;;  %1832 = vmatpush3.bf16.msra.mxu1 %v1829_v27  ;;  %v838_v27 = vrot.slane %v825_v21, %v2457_v20 }
 0x27e   :  { %1802 = vmatprep.subr.bf16.mxu0 %v1801_v36  ;;  %1834 = vmatprep.subr.bf16.mxu1 %v1833_v37 }
 0x281   :  { %1804 = vmatpush1.bf16.msra.mxu0 %v1803_v44  ;;  %1836 = vmatpush3.bf16.msra.mxu1 %v1833_v37 }
 0x282   :  { %1806 = vmatprep.subr.bf16.mxu0 %v1805_v45  ;;  %1838 = vmatprep.subr.bf16.mxu1 %v1837_v46 }
 0x285   :  { %1808 = vmatpush1.bf16.msra.mxu0 %v1807_v53  ;;  %1840 = vmatpush3.bf16.msra.mxu1 %v1837_v46 }
 0x286   :  { %1810 = vmatprep.subr.bf16.mxu0 %v1809_v54  ;;  %1842 = vmatprep.subr.bf16.mxu1 %v1841_v55  ;;  %v895_v54 = vld [vmem:[%s2549_s8] sm:$0xf] }
 0x287   :  { %v900_v59 = vrot.slane %v895_v54, %v2366_v24  ;;  %v904_v62 = vrot.slane %v895_v54, %v2372_v26  ;;  %v908_v8 = vrot.slane %v895_v54, %v2457_v20  ;;  %v912_v18 = vrot.slane %v895_v54, %v841_v7 }
 0x289   :  { %1812 = vmatpush1.bf16.msra.mxu0 %v1811_v60  ;;  %1844 = vmatpush3.bf16.msra.mxu1 %v1841_v55 }
 0x28a   :  { %1846 = vmatprep.subr.bf16.mxu0 %v1845_v61 }
 0x28c   :  { %1086 = vmatmul.mubr.f32.vlgmr.msra.gmra.mrb[8].mxu0 %v2380_v12  ;;  %1552 = vmatmul.mubr.f32.vlgmr.msra.gmra.mrb[8].mxu1 %v2385_v32 }
 0x28d   :  { %1848 = vmatpush3.bf16.msra.mxu0 %v1845_v61  ;;  %1091 = vmatprep.mubr.f32.mxu0 %v2172_v2  ;;  %v1215_v2 = vld [vmem:[%s2553_s12 + $0x40] sm:$0xff] }
 0x28e   :  { %1850 = vmatprep.subr.bf16.mxu0 %v1849_v0  ;;  %v1861_v11 = vpack.c.bf16 %v1216_v10, %v1215_v2 }
 0x290   :  { %1092 = vmatmul.mubr.f32.gmra.mrb[10].mxu0 %v2385_v32 }
 0x291   :  { %1852 = vmatpush3.bf16.msra.mxu0 %v1849_v0  ;;  %1586 = vmatprep.mubr.f32.mxu0 %v2380_v12  ;;  %v1218_v12 = vld [vmem:[%s2553_s12 + $0x58] sm:$0xff] }
 0x292   :  { %1854 = vmatprep.subr.bf16.mxu0 %v1853_v4  ;;  %v1865_v6 = vpack.c.bf16 %v1218_v12, %v1217_v13 }
 0x295   :  { %1856 = vmatpush3.bf16.msra.mxu0 %v1853_v4 }
 0x296   :  { %1858 = vmatprep.subr.bf16.mxu0 %v1857_v9 }
 0x299   :  { %1860 = vmatpush3.bf16.msra.mxu0 %v1857_v9 }
 0x29a   :  { %1862 = vmatprep.subr.bf16.mxu0 %v1861_v11 }
 0x29d   :  { %1864 = vmatpush3.bf16.msra.mxu0 %v1861_v11 }
 0x29e   :  { %1866 = vmatprep.subr.bf16.mxu0 %v1865_v6 }
 0x2a1   :  { %1868 = vmatpush3.bf16.msra.mxu0 %v1865_v6 }
 0x2a2   :  { %1870 = vmatprep.subr.bf16.mxu0 %v1869_v16 }
 0x2a5   :  { %1872 = vmatpush3.bf16.msra.mxu0 %v1869_v16 }
 0x2a6   :  { %1874 = vmatprep.subr.bf16.mxu0 %v1873_v19 }
 0x2a9   :  { %1876 = vmatpush3.bf16.msra.mxu0 %v1873_v19 }
 0x2ac   :  { %1587 = vmatmul.mubr.f32.vlgmr.msra.gmra.mrb[12].mxu0 %v2385_v32 }
 0x33f   :  { %v737_v30 = vpop.f32.mrb[4].mxu0  ;;  %v814_v32 = vpop.f32.mrb[4].mxu1 }
 0x340   :  { %v847_v31 = vadd.f32 %v830_v25, %v737_v30  ;;  %v849_v33 = vadd.f32 %v838_v27, %v814_v32  ;;  %v739_v34 = vpop.f32.mrb[5].mxu0  ;;  %v816_v35 = vpop.f32.mrb[5].mxu1 }
 0x341   :  { %v848_v36 = vadd.f32 %v834_v28, %v739_v34  ;;  %v850_v37 = vadd.f32 %v842_v29, %v816_v35 }
 0x342   :  { %v863_v38 = vmul.f32 0.70710677, %v847_v31  ;;  %v865_v39 = vmul.f32 0.70710677, %v849_v33  ;;  %v855_v57 = vmul.f32 0.5, %v847_v31  ;;  %v857_v1 = vmul.f32 0.5, %v849_v33 }
 0x343   :  { %v864_v40 = vmul.f32 0.70710677, %v848_v36  ;;  %v866_v41 = vmul.f32 0.70710677, %v850_v37  ;;  %v743_v42 = vpop.f32.mrb[6].mxu0  ;;  %v820_v43 = vpop.f32.mrb[6].mxu1 }
 0x344   :  { %1913 = verf.f32 %v863_v38  ;;  %v851_v44 = vadd.f32 %v830_v25, %v743_v42  ;;  %v853_v45 = vadd.f32 %v838_v27, %v820_v43  ;;  %v745_v46 = vpop.f32.mrb[7].mxu0  ;;  %v822_v47 = vpop.f32.mrb[7].mxu1  ;;  %v856_v3 = vmul.f32 0.5, %v848_v36 }
 0x345   :  { %1915 = verf.f32 %v865_v39  ;;  %v852_v48 = vadd.f32 %v834_v28, %v745_v46  ;;  %v854_v49 = vadd.f32 %v842_v29, %v822_v47  ;;  %v858_v11 = vmul.f32 0.5, %v850_v37 }
 0x346   :  { %1917 = verf.f32 %v864_v40  ;;  %v867_v50 = vmul.f32 0.70710677, %v851_v44  ;;  %v869_v51 = vmul.f32 0.70710677, %v853_v45  ;;  %v859_v6 = vmul.f32 0.5, %v851_v44 }
 0x347   :  { %1919 = verf.f32 %v866_v41  ;;  %v868_v52 = vmul.f32 0.70710677, %v852_v48  ;;  %v870_v53 = vmul.f32 0.70710677, %v854_v49  ;;  %v861_v27 = vmul.f32 0.5, %v853_v45 }
 0x348   :  { %1921 = verf.f32 %v867_v50  ;;  %v860_v28 = vmul.f32 0.5, %v852_v48  ;;  %v862_v36 = vmul.f32 0.5, %v854_v49  ;;  %v1009_v41 = vrot.slane %v1004_v23, %v2366_v24 }
 0x349   :  { %1923 = verf.f32 %v869_v51  ;;  %v1017_v49 = vrot.slane %v1004_v23, %v2457_v20 }
 0x34a   :  { %1925 = verf.f32 %v868_v52 }
 0x34b   :  { %1927 = verf.f32 %v870_v53 }
 0x34e   :  { %v1914_v55 = vpop.eup %1913 }
 0x34f   :  { %v1916_v56 = vpop.eup %1915  ;;  %v879_v58 = vadd.f32 1.0, %v1914_v55 }
 0x350   :  { %v1918_v60 = vpop.eup %1917  ;;  %v881_v61 = vadd.f32 1.0, %v1916_v56 }
 0x351   :  { %v1920_v63 = vpop.eup %1919  ;;  %v887_v0 = vmul.f32 %v879_v58, %v855_v57  ;;  %v880_v4 = vadd.f32 1.0, %v1918_v60  ;;  %v1013_v58 = vrot.slane %v1004_v23, %v2372_v26 }
 0x352   :  { %v882_v5 = vadd.f32 1.0, %v1920_v63  ;;  %v1922_v9 = vpop.eup %1921  ;;  %v889_v2 = vmul.f32 %v881_v61, %v857_v1 }
 0x353   :  { %v888_v10 = vmul.f32 %v880_v4, %v856_v3  ;;  %v917_v13 = vmul.f32 %v900_v59, %v887_v0  ;;  %v1924_v12 = vpop.eup %1923  ;;  %v883_v14 = vadd.f32 1.0, %v1922_v9 }
 0x354   :  { %v1926_v15 = vpop.eup %1925  ;;  %v885_v16 = vadd.f32 1.0, %v1924_v12  ;;  %v890_v17 = vmul.f32 %v882_v5, %v858_v11  ;;  %v919_v32 = vmul.f32 %v908_v8, %v889_v2  ;;  %v1440_v11 = vld [vmem:[%s2554_s13] ss:$0 sm:$0xff] }
 0x355   :  { %v918_v19 = vmul.f32 %v904_v62, %v888_v10  ;;  %v1928_v21 = vpop.eup %1927  ;;  %v891_v25 = vmul.f32 %v883_v14, %v859_v6  ;;  %v884_v29 = vadd.f32 1.0, %v1926_v15 }
 0x356   :  { %v886_v30 = vadd.f32 1.0, %v1928_v21  ;;  %v893_v34 = vmul.f32 %v885_v16, %v861_v27  ;;  %v920_v37 = vmul.f32 %v912_v18, %v890_v17 }
 0x357   :  { %v925_v31 = vadd.f32 %v918_v19, %v917_v13  ;;  %v921_v33 = vmul.f32 %v900_v59, %v891_v25  ;;  %v892_v35 = vmul.f32 %v884_v29, %v860_v28 }
 0x358   :  { %v894_v39 = vmul.f32 %v886_v30, %v862_v36  ;;  %v923_v42 = vmul.f32 %v908_v8, %v893_v34 }
 0x359   :  { %v926_v38 = vadd.f32 %v925_v31, %v919_v32  ;;  %v922_v7 = vmul.f32 %v904_v62, %v892_v35 }
 0x35a   :  { %v924_v44 = vmul.f32 %v912_v18, %v894_v39 }
 0x35b   :  { %v927_v40 = vadd.f32 %v926_v38, %v920_v37  ;;  %v930_v43 = vadd.f32 %v922_v7, %v921_v33  ;;  %v1441_v37 = vld [vmem:[%s2555_s14] ss:$0 sm:$0xff]  ;;  %s2174_s14 = smov [#allocation14]  }
 0x35c   :  { %s1399_s9 = sshll.u32 %s2174_s14, 4  ;;  %s1400_s9 = int_to_ptr.vmem [resolvable:$true] %s1399_s9 }
 0x35d   :  { %928 = vadd.xlane.f32.xlu1 %v927_v40  ;;  %v931_v45 = vadd.f32 %v930_v43, %v923_v42  ;;  %v2173_v42 = vmov 0   ;;  %s2083_s0 = scalar_lea.vmem %s1400_s9, 256  ;;  %p2088_p13 = scmp.lt.s32.totalorder %s1400_s9, %s1400_s9 }
 0x35e   :  { %1903 = vset.pattern.permute.xlu0 %v2173_v42  ;;  %1904 = vset.pattern.permute.xlu1 %v2173_v42  ;;  %p2084_p12 = scmp.ne.s32.totalorder %s1400_s9, %s2083_s0  ;;  %p2089_p0 = scmp.lt.s32.totalorder %s2083_s0, %s2083_s0 }
 0x35f   :  { %v1087_v46 = vpop.f32.mrb[8].mxu0  ;;  %v1553_v47 = vpop.f32.mrb[8].mxu1  ;;  %v932_v52 = vadd.f32 %v931_v45, %v924_v44  ;;  %v1433_v44 = vld [vmem:[#allocation2] ss:$0 sm:$0xff]  ;;  %v1442_v45 = vld [vmem:[#allocation3] ss:$0 sm:$0xff] }
 0x360   :  { %v1088_v48 = vadd.f32 %v1087_v46, %v1009_v41  ;;  %v1089_v50 = vpop.f32.mrb[9].mxu0  ;;  %v1164_v51 = vpop.f32.mrb[9].mxu1  ;;  %v1170_v59 = vadd.f32 %v1553_v47, %v1017_v49  ;;  %p2090_p1 = por %p2089_p0, %p2088_p13 }
 0x361   :  { %933 = vadd.xlane.f32.xlu1 %v932_v52  ;;  %v1165_v55 = vadd.f32 %v1164_v51, %v1017_v49  ;;  %v1090_v61 = vadd.f32 %v1089_v50, %v1013_v58 }
 0x362   :  { %v1436_v53 = vmul.f32 -1.442695, %v1088_v48  ;;  %v1439_v62 = vmul.f32 -1.442695, %v1170_v59  ;;  %p2091_p2 = pnand %p2090_p1, %p2084_p12 }
 0x363   :  { %v1093_v54 = vpop.f32.mrb[10].mxu0  ;;  %v1438_v60 = vmul.f32 -1.442695, %v1165_v55 }
 0x364   :  { %1929 = vpow2.f32 %v1436_v53  ;;  %v1094_v56 = vadd.f32 %v1093_v54, %v1009_v41  ;;  %v1095_v24 = vpop.f32.mrb[11].mxu0 }
 0x365   :  { %v1096_v0 = vadd.f32 %v1095_v24, %v1013_v58 }
 0x366   :  { %v1437_v57 = vmul.f32 -1.442695, %v1094_v56 }
 0x368   :  { %1931 = vpow2.f32 %v1437_v57 }
 0x369   :  { %1933 = vpow2.f32 %v1438_v60 }
 0x36a   :  { %1935 = vtanh.f32 %v1090_v61 }
 0x36b   :  { %1937 = vpow2.f32 %v1439_v62 }
 0x36e   :  { %v1930_v20 = vpop.eup %1929 }
 0x36f   :  { %v1179_v63 = vadd.f32 1.0, %v1930_v20 }
 0x371   :  { %1939 = vrcp.f32 %v1179_v63 }
 0x372   :  { %v1932_v1 = vpop.eup %1931  ;;  %1941 = vtanh.f32 %v1096_v0 }
 0x373   :  { %v1180_v3 = vadd.f32 1.0, %v1932_v1  ;;  %v1934_v4 = vpop.eup %1933 }
 0x374   :  { %v1936_v5 = vpop.eup %1935  ;;  %v1193_v8 = vadd.f32 1.0, %v1934_v4 }
 0x375   :  { %1943 = vrcp.f32 %v1180_v3  ;;  %v1938_v26 = vpop.eup %1937 }
 0x376   :  { %v1194_v10 = vadd.f32 1.0, %v1938_v26  ;;  %1945 = vrcp.f32 %v1193_v8 }
 0x37b   :  { %v1940_v9 = vpop.eup %1939 }
 0x37c   :  { %v1199_v2 = vmul.f32 %v1940_v9, %v1936_v5  ;;  %v1942_v13 = vpop.eup %1941 }
 0x37e   :  { %1947 = vtanh.f32 %v1199_v2 }
 0x37f   :  { %v1944_v12 = vpop.eup %1943  ;;  %v1588_v6 = vpop.f32.mrb[12].mxu0  ;;  %1949 = vrcp.f32 %v1194_v10 }
 0x380   :  { %v1200_v14 = vmul.f32 %v1944_v12, %v1942_v13  ;;  %v1302_v15 = vadd.f32 %v1588_v6, %v1440_v11  ;;  %v1296_v16 = vpop.f32.mrb[13].mxu0  ;;  %v1946_v21 = vpop.eup %1945 }
 0x381   :  { %v1297_v17 = vadd.f32 %v1440_v11, %v1296_v16 }
 0x382   :  { %1951 = vtanh.f32 %v1200_v14  ;;  %v1308_v18 = vmul.f32 0.70710677, %v1302_v15  ;;  %v1306_v34 = vmul.f32 0.5, %v1302_v15 }
 0x383   :  { %v1307_v19 = vmul.f32 0.70710677, %v1297_v17  ;;  %v1305_v35 = vmul.f32 0.5, %v1297_v17 }
 0x384   :  { %1953 = verf.f32 %v1308_v18 }
 0x385   :  { %1955 = verf.f32 %v1307_v19 }
 0x388   :  { %v1948_v25 = vpop.eup %1947 }
 0x389   :  { %v1203_v27 = vmul.f32 %v1948_v25, %v1946_v21  ;;  %v1950_v28 = vpop.eup %1949 }
 0x38b   :  { %1205 = vst [vmem:[#allocation14] sm:$0xff] %v1203_v27 }
 0x38c   :  { %v1952_v29 = vpop.eup %1951 }
 0x38d   :  { %v1204_v30 = vmul.f32 %v1952_v29, %v1950_v28 }
 0x38e   :  { %v1954_v32 = vpop.eup %1953 }
 0x38f   :  { %v1956_v31 = vpop.eup %1955  ;;  %v1312_v33 = vadd.f32 1.0, %v1954_v32  ;;  %1206 = vst [vmem:[#allocation14 + $0x8] sm:$0xff] %v1204_v30 }
 0x390   :  { %v1311_v36 = vadd.f32 1.0, %v1956_v31 }
 0x391   :  { %v1314_v23 = vmul.f32 %v1312_v33, %v1306_v34 }
 0x392   :  { %v1313_v38 = vmul.f32 %v1311_v36, %v1305_v35 }
 0x393   :  { %v1323_v40 = vmul.f32 %v1441_v37, %v1314_v23 }
 0x394   :  { %v1322_v7 = vmul.f32 %v1441_v37, %v1313_v38 }
 0x395   :  { %v1328_v41 = vsel %vm1324_vm0, %v1323_v40, 0.0 }
 0x396   :  { %v1325_v39 = vsel %vm1324_vm0, %v1322_v7, 0.0 }
 0x397   :  { %1326 = vadd.xlane.f32.xlu0 %v1325_v39 }
 0x39b   :  { %1329 = vadd.xlane.f32.xlu0 %v1328_v41 }
 0x3ea   :  { %v929_v43 = vpop.xlane.xlu1 %928 }
 0x3eb   :  { %v942_v46 = vadd.f32 %v1433_v44, %v929_v43 }
 0x3ed   :  { %v1434_v51 = vmul.f32 -1.442695, %v942_v46 }
 0x3ee   :  { %v934_v49 = vpop.xlane.xlu1 %933 }
 0x3ef   :  { %v943_v53 = vadd.f32 %v1433_v44, %v934_v49 }
 0x3f1   :  { %v1435_v56 = vmul.f32 -1.442695, %v943_v53 }
 0x424   :  { %v1327_v47 = vpop.xlane.xlu0 %1326 }
 0x425   :  { %v1338_v48 = vadd.f32 %v1442_v45, %v1327_v47 }
 0x427   :  { %v1443_v50 = vmul.f32 -1.442695, %v1338_v48 }
 0x428   :  { %v1330_v52 = vpop.xlane.xlu0 %1329 }
 0x429   :  { %1957 = vpow2.f32 %v1443_v50  ;;  %v1339_v54 = vadd.f32 %v1442_v45, %v1330_v52 }
 0x42a   :  { %1959 = vpow2.f32 %v1434_v51 }
 0x42b   :  { %v1444_v55 = vmul.f32 -1.442695, %v1339_v54 }
 0x42d   :  { %1961 = vpow2.f32 %v1444_v55 }
 0x42e   :  { %1963 = vpow2.f32 %v1435_v56 }
 0x433   :  { %v1958_v24 = vpop.eup %1957 }
 0x434   :  { %v1346_v57 = vadd.f32 1.0, %v1958_v24  ;;  %v1960_v58 = vpop.eup %1959 }
 0x435   :  { %v950_v61 = vadd.f32 1.0, %v1960_v58 }
 0x436   :  { %1965 = vrcp.f32 %v1346_v57 }
 0x437   :  { %v1962_v59 = vpop.eup %1961 }
 0x438   :  { %v1347_v60 = vadd.f32 1.0, %v1962_v59  ;;  %v1964_v62 = vpop.eup %1963 }
 0x439   :  { %v951_v20 = vadd.f32 1.0, %v1964_v62 }
 0x43a   :  { %1967 = vrcp.f32 %v1347_v60 }
 0x43b   :  { %1969 = vrcp.f32 %v950_v61 }
 0x43c   :  { %1971 = vrcp.f32 %v951_v20 }
 0x440   :  { %v1966_v63 = vpop.eup %1965 }
 0x441   :  { %1358 = vperm.xlu0 %1903, %v1966_v63  }
 0x444   :  { %v1968_v0 = vpop.eup %1967 }
 0x445   :  { %1363 = vperm.xlu1 %1904, %v1968_v0   ;;  %v1970_v1 = vpop.eup %1969 }
 0x446   :  { %v1972_v3 = vpop.eup %1971 }
 0x449   :  { %1370 = vperm.xlu1 %1904, %v1970_v1  }
 0x44d   :  { %1375 = vperm.xlu1 %1904, %v1972_v3  }
 0x44e   :  { %2094 = shalt.err (!%p2091_p2)
}
 0x44f   :  { %s2095_s29 = scalar_lea.hbm %s2557_s17, 256 }
 0x450   :  { %p2096_p3 = scmp.ne.s32.totalorder %s2557_s17, %s2095_s29  ;;  %p2099_p4 = scmp.lt.u32.totalorder %s2095_s29, %s2557_s17 }
 0x452   :  { %p2101_p5 = pnand %p2099_p4, %p2096_p3 }
 0x454   :  { %2104 = shalt.err (!%p2101_p5)
}
 0x455   :  { %s2572_s26 = smov 8   ;;  %s2573_s27 = smov 128  }
 0x456   :  { %1405 = dma.vmem_to_hbm [thread:$0]  %s1400_s9, 256, %s2557_s17, [#allocation15], %s2573_s27, %s2573_s27, %s2572_s26  }
 0x457   :  { %s2105_s5 = scalar_lea.vmem %s2488_s15, 256  ;;  %p2110_p7 = scmp.lt.s32.totalorder %s2488_s15, %s2488_s15 }
 0x458   :  { %p2106_p6 = scmp.ne.s32.totalorder %s2488_s15, %s2105_s5  ;;  %p2111_p8 = scmp.lt.s32.totalorder %s2105_s5, %s2105_s5 }
 0x45a   :  { %p2112_p9 = por %p2111_p8, %p2110_p7 }
 0x45c   :  { %p2113_p10 = pnand %p2112_p9, %p2106_p6 }
 0x45e   :  { %2116 = shalt.err (!%p2113_p10)
}
 0x45f   :  { %s2117_s28 = scalar_lea.hbm %s2556_s16, 256 }
 0x460   :  { %p2118_p11 = scmp.ne.s32.totalorder %s2556_s16, %s2117_s28  ;;  %p2121_p12 = scmp.lt.u32.totalorder %s2117_s28, %s2556_s16 }
 0x462   :  { %p2123_p13 = pnand %p2121_p12, %p2118_p11 }
 0x464   :  { %2126 = shalt.err (!%p2123_p13)
}
 0x465   :  { %1393 = dma.vmem_to_hbm [thread:$0]  %s2488_s15, 256, %s2556_s16, [#allocation6], %s2573_s27, %s2573_s27, %s2572_s26   ;;  %v1353_v4 = vand.u32 127, %v166_v22 }
 0x466   :  { %s2176_s20 = smov [#allocation16]  }
 0x467   :  { %vm1355_vm1 = vcmp.eq.s32.totalorder %v1353_v4, 1  ;;  %vm1354_vm2 = vcmp.eq.s32.totalorder %v1353_v4, 0  ;;  %s1411_s13 = sshll.u32 %s2176_s20, 4  ;;  %s1412_s13 = int_to_ptr.vmem [resolvable:$true] %s1411_s13 }
 0x468   :  { %s2127_s22 = scalar_lea.vmem %s1412_s13, 256  ;;  %p2132_p1 = scmp.lt.s32.totalorder %s1412_s13, %s1412_s13 }
 0x469   :  { %p2128_p0 = scmp.ne.s32.totalorder %s1412_s13, %s2127_s22  ;;  %p2133_p2 = scmp.lt.s32.totalorder %s2127_s22, %s2127_s22 }
 0x46b   :  { %p2134_p3 = por %p2133_p2, %p2132_p1 }
 0x46d   :  { %p2135_p4 = pnand %p2134_p3, %p2128_p0 }
 0x4c0   :  { %v1359_v8 = vpop.permute.xlu0 %1358 }
 0x4c1   :  { %v1366_v26 = vsel %vm1355_vm1, %v1359_v8, 0.0 }
 0x4c4   :  { %v1364_v5 = vpop.permute.xlu1 %1363 }
 0x4c5   :  { %v1367_v10 = vsel %vm1355_vm1, %v1364_v5, 0.0 }
 0x4c8   :  { %v1371_v9 = vpop.permute.xlu1 %1370 }
 0x4c9   :  { %v1378_v2 = vsel %vm1354_vm2, %v1371_v9, %v1366_v26 }
 0x4ca   :  { %1380 = vst [vmem:[#allocation16] sm:$0xff] %v1378_v2 }
 0x4cc   :  { %v1376_v11 = vpop.permute.xlu1 %1375 }
 0x4cd   :  { %v1379_v13 = vsel %vm1354_vm2, %v1376_v11, %v1367_v10 }
 0x4ce   :  { %1381 = vst [vmem:[#allocation16 + $0x8] sm:$0xff] %v1379_v13 }
 0x4cf   :  { %2138 = shalt.err (!%p2135_p4)
}
 0x4d0   :  { %s2139_s9 = scalar_lea.hbm %s2558_s18, 256 }
 0x4d1   :  { %p2140_p5 = scmp.ne.s32.totalorder %s2558_s18, %s2139_s9  ;;  %p2143_p6 = scmp.lt.u32.totalorder %s2139_s9, %s2558_s18 }
 0x4d3   :  { %p2145_p7 = pnand %p2143_p6, %p2140_p5 }
 0x4d5   :  { %2148 = shalt.err (!%p2145_p7)
}
 0x4d6   :  { %1417 = dma.vmem_to_hbm [thread:$0]  %s1412_s13, 256, %s2558_s18, [#allocation15], %s2573_s27, %s2573_s27, %s2572_s26  }
 0x4d7   :  { %2155 = dma.done.wait [#allocation6], 256  }
 0x4d8   :  { %2156 = vsyncadd [#allocation6], 4294967040 }
 0x4d9   :  { %2157 = dma.done.wait [#allocation15], 512  }
 0x4da   :  { %2158 = vsyncadd [#allocation15], 4294966784 }
 0x4db   :  { %1427 = vsyncpa [#allocation5], 1 }
 0x4dc   :  { %1428 = vsyncpa [#allocation8], 1 }
 0x4dd   :  { %1429 = vsyncpa [#allocation11], 1 }
 0x4de   :  { %1430 = vsyncpa [#allocation6], 1 }
 0x4df   :  { %1431 = vsyncpa [#allocation15], 1 }

</bundles_post_ra>
